<compile_context>
chip_gen: v7x
topology: tpu7x:2x2x1
jax: 0.10.0
libtpu: 0.0.40
codegen_flags: <defaults>
</compile_context>

<pallas_src>
import numpy as np
import jax
import jax.numpy as jnp
from jax.experimental import pallas as pl
from jax.experimental.pallas import tpu as pltpu


def cbam_kernel(x_ref, w1_ref, b1_ref, w2_ref, b2_ref, km_ref, kx_ref, cb_ref,
                o_ref):
    Bb, C, HW = x_ref.shape

    # Per-image pooled stats.  2-D keepdims reductions keep the lane-dense
    # layout; the Python loop over the (static) sub-batch is unrolled at trace
    # time and only the tiny (C,1) pooling work is per-image -- the matmuls
    # below are batched across all Bb images.
    xs, mean_cols, max_cols = [], [], []
    for b in range(Bb):
        xb = x_ref[b].astype(jnp.float32)                       # (C, HW)
        xs.append(xb)
        mean_cols.append(jnp.sum(xb, axis=1, keepdims=True) * (1.0 / HW))
        max_cols.append(jnp.max(xb, axis=1, keepdims=True))

    # ---- Channel attention: one shared-MLP pass over all 2*Bb pooled vectors
    p_cat = jnp.concatenate(mean_cols + max_cols, axis=1).astype(jnp.bfloat16)  # (C, 2*Bb)
    h = jnp.dot(w1_ref[...], p_cat, preferred_element_type=jnp.float32) + b1_ref[...]
    h = jnp.maximum(h, 0.0).astype(jnp.bfloat16)                # (Cr, 2*Bb)
    o2 = jnp.dot(w2_ref[...], h, preferred_element_type=jnp.float32) + b2_ref[...]
    # column b = mlp(mean_b), column Bb+b = mlp(max_b); each includes b2 once,
    # matching the reference (MLP applied to each pooled vector, then summed).

    # ---- Channel scaling + per-image spatial pooled maps --------------------
    x_cas, mean_rows, max_rows = [], [], []
    for b in range(Bb):
        attn_c = jax.nn.sigmoid(o2[:, b:b + 1] + o2[:, Bb + b:Bb + b + 1])  # (C, 1)
        x_ca = xs[b] * attn_c                                   # (C, HW), transient
        x_cas.append(x_ca)
        mean_rows.append(jnp.sum(x_ca, axis=0, keepdims=True) * (1.0 / C))   # (1, HW)
        max_rows.append(jnp.max(x_ca, axis=0, keepdims=True))                # (1, HW)

    # ---- Spatial attention: whole 7x7 conv as two (Bb,HW)x(HW,HW) matmuls ---
    m_mean = jnp.concatenate(mean_rows, axis=0).astype(jnp.bfloat16)         # (Bb, HW)
    m_max = jnp.concatenate(max_rows, axis=0).astype(jnp.bfloat16)           # (Bb, HW)
    acc = (jnp.dot(m_mean, km_ref[...], preferred_element_type=jnp.float32)
           + jnp.dot(m_max, kx_ref[...], preferred_element_type=jnp.float32)
           + cb_ref[0])
    attn_s = jax.nn.sigmoid(acc)                                # (Bb, HW)

    for b in range(Bb):
        o_ref[b] = (x_cas[b] * attn_s[b:b + 1, :]).astype(o_ref.dtype)


def _build_conv_operator(conv_w, H, W):
    """Fold the (1, 2, 7, 7) conv weights into a dense (2*H*W, H*W) operator.

    out_flat[h*W+w] = sum_{c,h',w'} feat_flat[c*H*W + h'*W + w'] * K[row, h*W+w]
    with K[row, col] = cw[c, h'-h+3, w'-w+3] when the tap lies inside the 7x7
    window, 0 otherwise (zero padding baked in).  Channel order = [mean, max].
    """
    cw = np.asarray(conv_w, dtype=np.float32).reshape(2, 7, 7)
    dh = np.arange(H)[:, None] - np.arange(H)[None, :] + 3       # (h_src, h_dst)
    dw = np.arange(W)[:, None] - np.arange(W)[None, :] + 3       # (w_src, w_dst)
    vh = (dh >= 0) & (dh <= 6)
    vw = (dw >= 0) & (dw <= 6)
    dhc = np.clip(dh, 0, 6)
    dwc = np.clip(dw, 0, 6)
    valid = vh[:, :, None, None] & vw[None, None, :, :]          # (H, H, W, W)

    K = np.zeros((2, H, W, H, W), np.float32)
    for c in range(2):
        tap = cw[c][dhc[:, :, None, None], dwc[None, None, :, :]]  # (h',h,w',w)
        tap = np.where(valid, tap, 0.0)
        K[c] = np.transpose(tap, (0, 2, 1, 3))                     # (h',w',h,w)
    K = K.reshape(2 * H * W, H * W)
    return jnp.asarray(K, dtype=jnp.bfloat16)                      # MXU-native


def _pick_sub_batch(B, C, HW, itemsize):
    """Largest Bb that (a) divides B, (b) leaves >= 2 grid steps when B >= 2
    (both v7x TensorCores get work), and (c) keeps the double-buffered in+out
    x blocks under ~8 MiB (safe on every generation's scoped VMEM)."""
    limit = 8 << 20
    best = 1
    for bb in range(1, B + 1):
        if B % bb:
            continue
        if B >= 2 and (B // bb) < 2:
            continue
        if 4 * bb * C * HW * itemsize > limit:   # 2 buffers x (in + out)
            continue
        best = bb
    return best


def cbam_pallas(x, w1, b1, w2, b2, conv_w, conv_b):
    B, C, H, W = x.shape
    Cr = w1.shape[0]
    HW = H * W

    K = _build_conv_operator(conv_w, H, W)                   # (2*HW, HW) bf16
    k_mean, k_max = K[:HW], K[HW:]                           # split halves

    Bb = _pick_sub_batch(B, C, HW, x.dtype.itemsize)
    steps = B // Bb

    x_flat = x.reshape(B, C, HW)                             # lane-dense view
    w1b = w1.astype(jnp.bfloat16)                            # (Cr, C)
    w2b = w2.astype(jnp.bfloat16)                            # (C, Cr)
    b1c = b1.reshape(Cr, 1).astype(jnp.float32)
    b2c = b2.reshape(C, 1).astype(jnp.float32)
    cb = conv_b.reshape(1).astype(jnp.float32)

    # VMEM budget from the actual allocations: 2x double-buffered (in + out)
    # x block + constants (budgeted at 2x in case single-buffering is ignored)
    # + 2 MiB headroom.  Clamp to [16 MiB, 48 MiB]: safe under v7x's 64 MiB
    # VMEM, plenty of slack on v5e/v6e (128 MiB).
    block_bytes = Bb * C * HW * x.dtype.itemsize
    const_bytes = (k_mean.size + k_max.size + w1b.size + w2b.size) * 2 \
        + (b1c.size + b2c.size) * 4
    vmem_limit = int(min(max(4 * block_bytes + 2 * const_bytes + (2 << 20),
                             16 << 20), 48 << 20))

    def call(single_buffer_consts):
        def const_spec(shape):
            idx = lambda b: (0,) * len(shape)
            if single_buffer_consts and hasattr(pl, "Buffered"):
                # Grid-invariant operand: fetch once, no double-buffering.
                return pl.BlockSpec(shape, idx, pipeline_mode=pl.Buffered(1))
            return pl.BlockSpec(shape, idx)

        return pl.pallas_call(
            cbam_kernel,
            out_shape=jax.ShapeDtypeStruct((B, C, HW), x.dtype),
            grid=(steps,),
            in_specs=[
                pl.BlockSpec((Bb, C, HW), lambda b: (b, 0, 0)),      # x (flat)
                const_spec((Cr, C)),                                 # W1
                const_spec((Cr, 1)),                                 # b1
                const_spec((C, Cr)),                                 # W2
                const_spec((C, 1)),                                  # b2
                const_spec((HW, HW)),                                # conv op (mean ch)
                const_spec((HW, HW)),                                # conv op (max ch)
                pl.BlockSpec(memory_space=pltpu.MemorySpace.SMEM),   # conv bias
            ],
            out_specs=pl.BlockSpec((Bb, C, HW), lambda b: (b, 0, 0)),
            compiler_params=pltpu.CompilerParams(
                dimension_semantics=("parallel",),
                vmem_limit_bytes=vmem_limit),
        )(x_flat, w1b, b1c, w2b, b2c, k_mean, k_max, cb)

    try:
        out_flat = call(True)       # single-buffer the invariant operands
    except Exception:
        out_flat = call(False)      # fallback: default double-buffering
    return out_flat.reshape(B, C, H, W)


def cbam_ref(x, w1, b1, w2, b2, conv_w, conv_b):
    """Pure-JAX reference mirroring the PyTorch module (per-op high precision)."""
    hp = jax.lax.Precision.HIGHEST
    max_p = jnp.max(x, axis=(2, 3))
    mean_p = jnp.mean(x, axis=(2, 3))

    def mlp(p):
        h = jnp.maximum(jnp.dot(p, w1.T, precision=hp) + b1, 0.0)
        return jnp.dot(h, w2.T, precision=hp) + b2

    attn_c = jax.nn.sigmoid(mlp(max_p) + mlp(mean_p))
    xc = x * attn_c[:, :, None, None]
    mx = jnp.max(xc, axis=1, keepdims=True)
    mn = jnp.mean(xc, axis=1, keepdims=True)
    feat = jnp.concatenate([mn, mx], axis=1)                 # torch cat([mean, max])
    attn_s = jax.lax.conv_general_dilated(
        feat, conv_w, (1, 1), ((3, 3), (3, 3)),
        dimension_numbers=("NCHW", "OIHW", "NCHW"), precision=hp)
    attn_s = jax.nn.sigmoid(attn_s + conv_b.reshape(1, 1, 1, 1))
    return xc * attn_s


if __name__ == "__main__":
    B, C, H, W = 2, 16, 16, 16
    r = 8
    Cr = C // r

    key = jax.random.PRNGKey(0)
    k1, k2, k3, k4, k5, k6, kx = jax.random.split(key, 7)
    # Deterministic synthetic parameters (shapes from the module __init__).
    w1 = jax.random.normal(k1, (Cr, C), jnp.float32) * 0.3        # Linear(C -> C//r).weight
    b1 = jax.random.normal(k2, (Cr,), jnp.float32) * 0.1
    w2 = jax.random.normal(k3, (C, Cr), jnp.float32) * 0.3        # Linear(C//r -> C).weight
    b2 = jax.random.normal(k4, (C,), jnp.float32) * 0.1
    conv_w = jax.random.normal(k5, (1, 2, 7, 7), jnp.float32) * 0.1   # Conv2d(2,1,7,pad=3).weight
    conv_b = jax.random.normal(k6, (1,), jnp.float32) * 0.1           # Conv2d bias
    x = jax.random.normal(kx, (B, C, H, W), jnp.float32)

    out = jax.block_until_ready(cbam_pallas(x, w1, b1, w2, b2, conv_w, conv_b))
    ref = jax.block_until_ready(cbam_ref(x, w1, b1, w2, b2, conv_w, conv_b))

    np.testing.assert_allclose(np.asarray(out), np.asarray(ref), rtol=2e-2, atol=2e-2)
    print("KERNEL_OK")
</pallas_src>

<mosaic_0001>
module attributes {stable_mosaic.version = 11 : i64} {
  func.func @cbam_kernel(%arg0: i32, %arg1: memref<1x16x256xf32, #tpu.memory_space<vmem>>, %arg2: memref<2x16xbf16, #tpu.memory_space<vmem>>, %arg3: memref<2x1xf32, #tpu.memory_space<vmem>>, %arg4: memref<16x2xbf16, #tpu.memory_space<vmem>>, %arg5: memref<16x1xf32, #tpu.memory_space<vmem>>, %arg6: memref<256x256xbf16, #tpu.memory_space<vmem>>, %arg7: memref<256x256xbf16, #tpu.memory_space<vmem>>, %arg8: memref<1xf32, #tpu.memory_space<smem>>, %arg9: memref<1x16x256xf32, #tpu.memory_space<vmem>>) attributes {dimension_semantics = [#tpu.dimension_semantics<parallel>], iteration_bounds = array<i64: 2>, scalar_prefetch = 0 : i64, scratch_operands = 0 : i64, tpu.core_type = #tpu.core_type<tc>, window_params = [{transform_indices = @transform_0, window_bounds = array<i64: 1, 16, 256>}, {pipeline_mode = #tpu.pipeline_mode<synchronous>, transform_indices = @transform_1, window_bounds = array<i64: 2, 16>}, {pipeline_mode = #tpu.pipeline_mode<synchronous>, transform_indices = @transform_2, window_bounds = array<i64: 2, 1>}, {pipeline_mode = #tpu.pipeline_mode<synchronous>, transform_indices = @transform_3, window_bounds = array<i64: 16, 2>}, {pipeline_mode = #tpu.pipeline_mode<synchronous>, transform_indices = @transform_4, window_bounds = array<i64: 16, 1>}, {pipeline_mode = #tpu.pipeline_mode<synchronous>, transform_indices = @transform_5, window_bounds = array<i64: 256, 256>}, {pipeline_mode = #tpu.pipeline_mode<synchronous>, transform_indices = @transform_6, window_bounds = array<i64: 256, 256>}, {transform_indices = @transform_7, window_bounds = array<i64: 1>}, {transform_indices = @transform_8, window_bounds = array<i64: 1, 16, 256>}]} {
    %c0 = arith.constant 0 : index
    %c0_0 = arith.constant 0 : index
    %c0_1 = arith.constant 0 : index
    %0 = vector.load %arg1[%c0, %c0_0, %c0_1] : memref<1x16x256xf32, #tpu.memory_space<vmem>>, vector<1x16x256xf32>
    %1 = vector.shape_cast %0 : vector<1x16x256xf32> to vector<16x256xf32>
    %cst = arith.constant dense<0.000000e+00> : vector<16xf32>
    %2 = vector.multi_reduction <add>, %1, %cst [1] : vector<16x256xf32> to vector<16xf32>
    %3 = vector.shape_cast %2 : vector<16xf32> to vector<16x1xf32>
    %cst_2 = arith.constant 3.906250e-03 : f32
    %4 = vector.broadcast %cst_2 : f32 to vector<16x1xf32>
    %5 = arith.mulf %3, %4 : vector<16x1xf32>
    %cst_3 = arith.constant dense<0xFF800000> : vector<16xf32>
    %6 = vector.multi_reduction <maximumf>, %1, %cst_3 [1] : vector<16x256xf32> to vector<16xf32>
    %7 = vector.shape_cast %6 : vector<16xf32> to vector<16x1xf32>
    %8 = tpu.concatenate %5, %7 in 1 : vector<16x1xf32>, vector<16x1xf32> -> vector<16x2xf32>
    %9 = arith.truncf %8 : vector<16x2xf32> to vector<16x2xbf16>
    %c0_4 = arith.constant 0 : index
    %c0_5 = arith.constant 0 : index
    %10 = vector.load %arg2[%c0_4, %c0_5] : memref<2x16xbf16, #tpu.memory_space<vmem>>, vector<2x16xbf16>
    %cst_6 = arith.constant dense<0.000000e+00> : vector<2x2xf32>
    %11 = tpu.matmul %10, %9, %cst_6 {dimension_numbers = #tpu.dot_dimension_numbers<[1], [0], [0], [1], [0, 0, 1, 1], [], []>} : vector<2x16xbf16>, vector<16x2xbf16>, vector<2x2xf32> -> vector<2x2xf32>
    %c0_7 = arith.constant 0 : index
    %c0_8 = arith.constant 0 : index
    %12 = vector.load %arg3[%c0_7, %c0_8] : memref<2x1xf32, #tpu.memory_space<vmem>>, vector<2x1xf32>
    %13 = vector.broadcast %12 : vector<2x1xf32> to vector<2x2xf32>
    %14 = arith.addf %11, %13 : vector<2x2xf32>
    %cst_9 = arith.constant 0.000000e+00 : f32
    %15 = vector.broadcast %cst_9 : f32 to vector<2x2xf32>
    %16 = arith.maximumf %14, %15 : vector<2x2xf32>
    %17 = arith.truncf %16 : vector<2x2xf32> to vector<2x2xbf16>
    %c0_10 = arith.constant 0 : index
    %c0_11 = arith.constant 0 : index
    %18 = vector.load %arg4[%c0_10, %c0_11] : memref<16x2xbf16, #tpu.memory_space<vmem>>, vector<16x2xbf16>
    %cst_12 = arith.constant dense<0.000000e+00> : vector<16x2xf32>
    %19 = tpu.matmul %18, %17, %cst_12 {dimension_numbers = #tpu.dot_dimension_numbers<[1], [0], [0], [1], [0, 0, 1, 1], [], []>} : vector<16x2xbf16>, vector<2x2xbf16>, vector<16x2xf32> -> vector<16x2xf32>
    %c0_13 = arith.constant 0 : index
    %c0_14 = arith.constant 0 : index
    %20 = vector.load %arg5[%c0_13, %c0_14] : memref<16x1xf32, #tpu.memory_space<vmem>>, vector<16x1xf32>
    %21 = vector.broadcast %20 : vector<16x1xf32> to vector<16x2xf32>
    %22 = arith.addf %19, %21 : vector<16x2xf32>
    %23 = vector.extract_strided_slice %22 {offsets = [0, 0], sizes = [16, 1], strides = [1, 1]} : vector<16x2xf32> to vector<16x1xf32>
    %24 = vector.extract_strided_slice %22 {offsets = [0, 1], sizes = [16, 1], strides = [1, 1]} : vector<16x2xf32> to vector<16x1xf32>
    %25 = arith.addf %23, %24 : vector<16x1xf32>
    %26 = arith.negf %25 : vector<16x1xf32>
    %27 = math.exp %26 : vector<16x1xf32>
    %cst_15 = arith.constant 1.000000e+00 : f32
    %28 = vector.broadcast %cst_15 : f32 to vector<16x1xf32>
    %29 = arith.addf %28, %27 : vector<16x1xf32>
    %30 = arith.divf %28, %29 : vector<16x1xf32>
    %31 = vector.broadcast %30 : vector<16x1xf32> to vector<16x256xf32>
    %32 = arith.mulf %1, %31 : vector<16x256xf32>
    %cst_16 = arith.constant dense<0.000000e+00> : vector<256xf32>
    %33 = vector.multi_reduction <add>, %32, %cst_16 [0] : vector<16x256xf32> to vector<256xf32>
    %34 = vector.shape_cast %33 : vector<256xf32> to vector<1x256xf32>
    %cst_17 = arith.constant 6.250000e-02 : f32
    %35 = vector.broadcast %cst_17 : f32 to vector<1x256xf32>
    %36 = arith.mulf %34, %35 : vector<1x256xf32>
    %cst_18 = arith.constant dense<0xFF800000> : vector<256xf32>
    %37 = vector.multi_reduction <maximumf>, %32, %cst_18 [0] : vector<16x256xf32> to vector<256xf32>
    %38 = vector.shape_cast %37 : vector<256xf32> to vector<1x256xf32>
    %39 = arith.truncf %36 : vector<1x256xf32> to vector<1x256xbf16>
    %40 = arith.truncf %38 : vector<1x256xf32> to vector<1x256xbf16>
    %c0_19 = arith.constant 0 : index
    %c0_20 = arith.constant 0 : index
    %41 = vector.load %arg6[%c0_19, %c0_20] : memref<256x256xbf16, #tpu.memory_space<vmem>>, vector<256x256xbf16>
    %cst_21 = arith.constant dense<0.000000e+00> : vector<1x256xf32>
    %42 = tpu.matmul %39, %41, %cst_21 {dimension_numbers = #tpu.dot_dimension_numbers<[1], [0], [0], [1], [0, 0, 1, 1], [], []>} : vector<1x256xbf16>, vector<256x256xbf16>, vector<1x256xf32> -> vector<1x256xf32>
    %c0_22 = arith.constant 0 : index
    %c0_23 = arith.constant 0 : index
    %43 = vector.load %arg7[%c0_22, %c0_23] : memref<256x256xbf16, #tpu.memory_space<vmem>>, vector<256x256xbf16>
    %cst_24 = arith.constant dense<0.000000e+00> : vector<1x256xf32>
    %44 = tpu.matmul %40, %43, %cst_24 {dimension_numbers = #tpu.dot_dimension_numbers<[1], [0], [0], [1], [0, 0, 1, 1], [], []>} : vector<1x256xbf16>, vector<256x256xbf16>, vector<1x256xf32> -> vector<1x256xf32>
    %45 = arith.addf %42, %44 : vector<1x256xf32>
    %c0_25 = arith.constant 0 : index
    %46 = memref.load %arg8[%c0_25] : memref<1xf32, #tpu.memory_space<smem>>
    %47 = vector.broadcast %46 : f32 to vector<1x256xf32>
    %48 = arith.addf %45, %47 : vector<1x256xf32>
    %49 = arith.negf %48 : vector<1x256xf32>
    %50 = math.exp %49 : vector<1x256xf32>
    %cst_26 = arith.constant 1.000000e+00 : f32
    %51 = vector.broadcast %cst_26 : f32 to vector<1x256xf32>
    %52 = arith.addf %51, %50 : vector<1x256xf32>
    %53 = arith.divf %51, %52 : vector<1x256xf32>
    %54 = vector.broadcast %53 : vector<1x256xf32> to vector<16x256xf32>
    %55 = arith.mulf %32, %54 : vector<16x256xf32>
    %c0_27 = arith.constant 0 : index
    %c0_28 = arith.constant 0 : index
    %c0_29 = arith.constant 0 : index
    %56 = vector.load %arg9[%c0_27, %c0_28, %c0_29] : memref<1x16x256xf32, #tpu.memory_space<vmem>>, vector<1x16x256xf32>
    %57 = vector.shape_cast %56 : vector<1x16x256xf32> to vector<16x256xf32>
    %58 = vector.shape_cast %55 : vector<16x256xf32> to vector<1x16x256xf32>
    tpu.vector_store %arg9[%c0_27, %c0_28, %c0_29], %58 {strides = array<i32>} : memref<1x16x256xf32, #tpu.memory_space<vmem>>, vector<1x16x256xf32>,
    return
  }
  func.func @transform_0(%arg0: i32) -> (i32, i32, i32) {
    %c0_i32 = arith.constant 0 : i32
    %c0_i32_0 = arith.constant 0 : i32
    %c0_i32_1 = arith.constant 0 : i32
    return %arg0, %c0_i32, %c0_i32_0 : i32, i32, i32
  }
  func.func @transform_1(%arg0: i32) -> (i32, i32) {
    %c0_i32 = arith.constant 0 : i32
    %c0_i32_0 = arith.constant 0 : i32
    %c0_i32_1 = arith.constant 0 : i32
    return %c0_i32, %c0_i32_0 : i32, i32
  }
  func.func @transform_2(%arg0: i32) -> (i32, i32) {
    %c0_i32 = arith.constant 0 : i32
    %c0_i32_0 = arith.constant 0 : i32
    %c0_i32_1 = arith.constant 0 : i32
    return %c0_i32, %c0_i32_0 : i32, i32
  }
  func.func @transform_3(%arg0: i32) -> (i32, i32) {
    %c0_i32 = arith.constant 0 : i32
    %c0_i32_0 = arith.constant 0 : i32
    %c0_i32_1 = arith.constant 0 : i32
    return %c0_i32, %c0_i32_0 : i32, i32
  }
  func.func @transform_4(%arg0: i32) -> (i32, i32) {
    %c0_i32 = arith.constant 0 : i32
    %c0_i32_0 = arith.constant 0 : i32
    %c0_i32_1 = arith.constant 0 : i32
    return %c0_i32, %c0_i32_0 : i32, i32
  }
  func.func @transform_5(%arg0: i32) -> (i32, i32) {
    %c0_i32 = arith.constant 0 : i32
    %c0_i32_0 = arith.constant 0 : i32
    %c0_i32_1 = arith.constant 0 : i32
    return %c0_i32, %c0_i32_0 : i32, i32
  }
  func.func @transform_6(%arg0: i32) -> (i32, i32) {
    %c0_i32 = arith.constant 0 : i32
    %c0_i32_0 = arith.constant 0 : i32
    %c0_i32_1 = arith.constant 0 : i32
    return %c0_i32, %c0_i32_0 : i32, i32
  }
  func.func @transform_7(%arg0: i32) -> i32 {
    %c0_i32 = arith.constant 0 : i32
    %c0_i32_0 = arith.constant 0 : i32
    return %c0_i32 : i32
  }
  func.func @transform_8(%arg0: i32) -> (i32, i32, i32) {
    %c0_i32 = arith.constant 0 : i32
    %c0_i32_0 = arith.constant 0 : i32
    %c0_i32_1 = arith.constant 0 : i32
    return %arg0, %c0_i32, %c0_i32_0 : i32, i32, i32
  }
}

module attributes {stable_mosaic.version = 11 : i64} {
  func.func @cbam_kernel(%arg0: i32, %arg1: memref<1x16x256xf32, #tpu.memory_space<vmem>>, %arg2: memref<2x16xbf16, #tpu.memory_space<vmem>>, %arg3: memref<2x1xf32, #tpu.memory_space<vmem>>, %arg4: memref<16x2xbf16, #tpu.memory_space<vmem>>, %arg5: memref<16x1xf32, #tpu.memory_space<vmem>>, %arg6: memref<256x256xbf16, #tpu.memory_space<vmem>>, %arg7: memref<256x256xbf16, #tpu.memory_space<vmem>>, %arg8: memref<1xf32, #tpu.memory_space<smem>>, %arg9: memref<1x16x256xf32, #tpu.memory_space<vmem>>) attributes {dimension_semantics = [#tpu.dimension_semantics<parallel>], iteration_bounds = array<i64: 2>, scalar_prefetch = 0 : i64, scratch_operands = 0 : i64, tpu.core_type = #tpu.core_type<tc>, window_params = [{transform_indices = @transform_0, window_bounds = array<i64: 1, 16, 256>}, {pipeline_mode = #tpu.pipeline_mode<synchronous>, transform_indices = @transform_1, window_bounds = array<i64: 2, 16>}, {pipeline_mode = #tpu.pipeline_mode<synchronous>, transform_indices = @transform_2, window_bounds = array<i64: 2, 1>}, {pipeline_mode = #tpu.pipeline_mode<synchronous>, transform_indices = @transform_3, window_bounds = array<i64: 16, 2>}, {pipeline_mode = #tpu.pipeline_mode<synchronous>, transform_indices = @transform_4, window_bounds = array<i64: 16, 1>}, {pipeline_mode = #tpu.pipeline_mode<synchronous>, transform_indices = @transform_5, window_bounds = array<i64: 256, 256>}, {pipeline_mode = #tpu.pipeline_mode<synchronous>, transform_indices = @transform_6, window_bounds = array<i64: 256, 256>}, {transform_indices = @transform_7, window_bounds = array<i64: 1>}, {transform_indices = @transform_8, window_bounds = array<i64: 1, 16, 256>}]} {
    %c0 = arith.constant 0 : index
    %c0_0 = arith.constant 0 : index
    %c0_1 = arith.constant 0 : index
    %0 = vector.load %arg1[%c0, %c0_0, %c0_1] : memref<1x16x256xf32, #tpu.memory_space<vmem>>, vector<1x16x256xf32>
    %1 = vector.shape_cast %0 : vector<1x16x256xf32> to vector<16x256xf32>
    %cst = arith.constant dense<0.000000e+00> : vector<16xf32>
    %2 = vector.multi_reduction <add>, %1, %cst [1] : vector<16x256xf32> to vector<16xf32>
    %3 = vector.shape_cast %2 : vector<16xf32> to vector<16x1xf32>
    %cst_2 = arith.constant 3.906250e-03 : f32
    %4 = vector.broadcast %cst_2 : f32 to vector<16x1xf32>
    %5 = arith.mulf %3, %4 : vector<16x1xf32>
    %cst_3 = arith.constant dense<0xFF800000> : vector<16xf32>
    %6 = vector.multi_reduction <maximumf>, %1, %cst_3 [1] : vector<16x256xf32> to vector<16xf32>
    %7 = vector.shape_cast %6 : vector<16xf32> to vector<16x1xf32>
    %8 = tpu.concatenate %5, %7 in 1 : vector<16x1xf32>, vector<16x1xf32> -> vector<16x2xf32>
    %9 = arith.truncf %8 : vector<16x2xf32> to vector<16x2xbf16>
    %c0_4 = arith.constant 0 : index
    %c0_5 = arith.constant 0 : index
    %10 = vector.load %arg2[%c0_4, %c0_5] : memref<2x16xbf16, #tpu.memory_space<vmem>>, vector<2x16xbf16>
    %cst_6 = arith.constant dense<0.000000e+00> : vector<2x2xf32>
    %11 = tpu.matmul %10, %9, %cst_6 {dimension_numbers = #tpu.dot_dimension_numbers<[1], [0], [0], [1], [0, 0, 1, 1], [], []>} : vector<2x16xbf16>, vector<16x2xbf16>, vector<2x2xf32> -> vector<2x2xf32>
    %c0_7 = arith.constant 0 : index
    %c0_8 = arith.constant 0 : index
    %12 = vector.load %arg3[%c0_7, %c0_8] : memref<2x1xf32, #tpu.memory_space<vmem>>, vector<2x1xf32>
    %13 = vector.broadcast %12 : vector<2x1xf32> to vector<2x2xf32>
    %14 = arith.addf %11, %13 : vector<2x2xf32>
    %cst_9 = arith.constant 0.000000e+00 : f32
    %15 = vector.broadcast %cst_9 : f32 to vector<2x2xf32>
    %16 = arith.maximumf %14, %15 : vector<2x2xf32>
    %17 = arith.truncf %16 : vector<2x2xf32> to vector<2x2xbf16>
    %c0_10 = arith.constant 0 : index
    %c0_11 = arith.constant 0 : index
    %18 = vector.load %arg4[%c0_10, %c0_11] : memref<16x2xbf16, #tpu.memory_space<vmem>>, vector<16x2xbf16>
    %cst_12 = arith.constant dense<0.000000e+00> : vector<16x2xf32>
    %19 = tpu.matmul %18, %17, %cst_12 {dimension_numbers = #tpu.dot_dimension_numbers<[1], [0], [0], [1], [0, 0, 1, 1], [], []>} : vector<16x2xbf16>, vector<2x2xbf16>, vector<16x2xf32> -> vector<16x2xf32>
    %c0_13 = arith.constant 0 : index
    %c0_14 = arith.constant 0 : index
    %20 = vector.load %arg5[%c0_13, %c0_14] : memref<16x1xf32, #tpu.memory_space<vmem>>, vector<16x1xf32>
    %21 = vector.broadcast %20 : vector<16x1xf32> to vector<16x2xf32>
    %22 = arith.addf %19, %21 : vector<16x2xf32>
    %23 = vector.extract_strided_slice %22 {offsets = [0, 0], sizes = [16, 1], strides = [1, 1]} : vector<16x2xf32> to vector<16x1xf32>
    %24 = vector.extract_strided_slice %22 {offsets = [0, 1], sizes = [16, 1], strides = [1, 1]} : vector<16x2xf32> to vector<16x1xf32>
    %25 = arith.addf %23, %24 : vector<16x1xf32>
    %26 = arith.negf %25 : vector<16x1xf32>
    %27 = math.exp %26 : vector<16x1xf32>
    %cst_15 = arith.constant 1.000000e+00 : f32
    %28 = vector.broadcast %cst_15 : f32 to vector<16x1xf32>
    %29 = arith.addf %28, %27 : vector<16x1xf32>
    %30 = arith.divf %28, %29 : vector<16x1xf32>
    %31 = vector.broadcast %30 : vector<16x1xf32> to vector<16x256xf32>
    %32 = arith.mulf %1, %31 : vector<16x256xf32>
    %cst_16 = arith.constant dense<0.000000e+00> : vector<256xf32>
    %33 = vector.multi_reduction <add>, %32, %cst_16 [0] : vector<16x256xf32> to vector<256xf32>
    %34 = vector.shape_cast %33 : vector<256xf32> to vector<1x256xf32>
    %cst_17 = arith.constant 6.250000e-02 : f32
    %35 = vector.broadcast %cst_17 : f32 to vector<1x256xf32>
    %36 = arith.mulf %34, %35 : vector<1x256xf32>
    %cst_18 = arith.constant dense<0xFF800000> : vector<256xf32>
    %37 = vector.multi_reduction <maximumf>, %32, %cst_18 [0] : vector<16x256xf32> to vector<256xf32>
    %38 = vector.shape_cast %37 : vector<256xf32> to vector<1x256xf32>
    %39 = arith.truncf %36 : vector<1x256xf32> to vector<1x256xbf16>
    %40 = arith.truncf %38 : vector<1x256xf32> to vector<1x256xbf16>
    %c0_19 = arith.constant 0 : index
    %c0_20 = arith.constant 0 : index
    %41 = vector.load %arg6[%c0_19, %c0_20] : memref<256x256xbf16, #tpu.memory_space<vmem>>, vector<256x256xbf16>
    %cst_21 = arith.constant dense<0.000000e+00> : vector<1x256xf32>
    %42 = tpu.matmul %39, %41, %cst_21 {dimension_numbers = #tpu.dot_dimension_numbers<[1], [0], [0], [1], [0, 0, 1, 1], [], []>} : vector<1x256xbf16>, vector<256x256xbf16>, vector<1x256xf32> -> vector<1x256xf32>
    %c0_22 = arith.constant 0 : index
    %c0_23 = arith.constant 0 : index
    %43 = vector.load %arg7[%c0_22, %c0_23] : memref<256x256xbf16, #tpu.memory_space<vmem>>, vector<256x256xbf16>
    %cst_24 = arith.constant dense<0.000000e+00> : vector<1x256xf32>
    %44 = tpu.matmul %40, %43, %cst_24 {dimension_numbers = #tpu.dot_dimension_numbers<[1], [0], [0], [1], [0, 0, 1, 1], [], []>} : vector<1x256xbf16>, vector<256x256xbf16>, vector<1x256xf32> -> vector<1x256xf32>
    %45 = arith.addf %42, %44 : vector<1x256xf32>
    %c0_25 = arith.constant 0 : index
    %46 = memref.load %arg8[%c0_25] : memref<1xf32, #tpu.memory_space<smem>>
    %47 = vector.broadcast %46 : f32 to vector<1x256xf32>
    %48 = arith.addf %45, %47 : vector<1x256xf32>
    %49 = arith.negf %48 : vector<1x256xf32>
    %50 = math.exp %49 : vector<1x256xf32>
    %cst_26 = arith.constant 1.000000e+00 : f32
    %51 = vector.broadcast %cst_26 : f32 to vector<1x256xf32>
    %52 = arith.addf %51, %50 : vector<1x256xf32>
    %53 = arith.divf %51, %52 : vector<1x256xf32>
    %54 = vector.broadcast %53 : vector<1x256xf32> to vector<16x256xf32>
    %55 = arith.mulf %32, %54 : vector<16x256xf32>
    %c0_27 = arith.constant 0 : index
    %c0_28 = arith.constant 0 : index
    %c0_29 = arith.constant 0 : index
    %56 = vector.load %arg9[%c0_27, %c0_28, %c0_29] : memref<1x16x256xf32, #tpu.memory_space<vmem>>, vector<1x16x256xf32>
    %57 = vector.shape_cast %56 : vector<1x16x256xf32> to vector<16x256xf32>
    %58 = vector.shape_cast %55 : vector<16x256xf32> to vector<1x16x256xf32>
    tpu.vector_store %arg9[%c0_27, %c0_28, %c0_29], %58 {strides = array<i32>} : memref<1x16x256xf32, #tpu.memory_space<vmem>>, vector<1x16x256xf32>,
    return
  }
  func.func @transform_0(%arg0: i32) -> (i32, i32, i32) {
    %c0_i32 = arith.constant 0 : i32
    %c0_i32_0 = arith.constant 0 : i32
    %c0_i32_1 = arith.constant 0 : i32
    return %arg0, %c0_i32, %c0_i32_0 : i32, i32, i32
  }
  func.func @transform_1(%arg0: i32) -> (i32, i32) {
    %c0_i32 = arith.constant 0 : i32
    %c0_i32_0 = arith.constant 0 : i32
    %c0_i32_1 = arith.constant 0 : i32
    return %c0_i32, %c0_i32_0 : i32, i32
  }
  func.func @transform_2(%arg0: i32) -> (i32, i32) {
    %c0_i32 = arith.constant 0 : i32
    %c0_i32_0 = arith.constant 0 : i32
    %c0_i32_1 = arith.constant 0 : i32
    return %c0_i32, %c0_i32_0 : i32, i32
  }
  func.func @transform_3(%arg0: i32) -> (i32, i32) {
    %c0_i32 = arith.constant 0 : i32
    %c0_i32_0 = arith.constant 0 : i32
    %c0_i32_1 = arith.constant 0 : i32
    return %c0_i32, %c0_i32_0 : i32, i32
  }
  func.func @transform_4(%arg0: i32) -> (i32, i32) {
    %c0_i32 = arith.constant 0 : i32
    %c0_i32_0 = arith.constant 0 : i32
    %c0_i32_1 = arith.constant 0 : i32
    return %c0_i32, %c0_i32_0 : i32, i32
  }
  func.func @transform_5(%arg0: i32) -> (i32, i32) {
    %c0_i32 = arith.constant 0 : i32
    %c0_i32_0 = arith.constant 0 : i32
    %c0_i32_1 = arith.constant 0 : i32
    return %c0_i32, %c0_i32_0 : i32, i32
  }
  func.func @transform_6(%arg0: i32) -> (i32, i32) {
    %c0_i32 = arith.constant 0 : i32
    %c0_i32_0 = arith.constant 0 : i32
    %c0_i32_1 = arith.constant 0 : i32
    return %c0_i32, %c0_i32_0 : i32, i32
  }
  func.func @transform_7(%arg0: i32) -> i32 {
    %c0_i32 = arith.constant 0 : i32
    %c0_i32_0 = arith.constant 0 : i32
    return %c0_i32 : i32
  }
  func.func @transform_8(%arg0: i32) -> (i32, i32, i32) {
    %c0_i32 = arith.constant 0 : i32
    %c0_i32_0 = arith.constant 0 : i32
    %c0_i32_1 = arith.constant 0 : i32
    return %arg0, %c0_i32, %c0_i32_0 : i32, i32, i32
  }
}

</mosaic_0001>

<bundles_post_ra>
// kernel: tpu_custom_call.1
= control target key start
LH: loop header
LB: loop body
LE: loop exit
PB: predicated region body
PF: predicated region fallthrough
CT: control target
= control target key end

     0   :  { %s1992_s0 = inlined_call_operand.hbm [shape: f32[2,16,256], index: 0, kind: input, shape index: {}]   ;;  %s1993_s1 = inlined_call_operand.vmem [shape: bf16[2,16], index: 1, kind: input, shape index: {}]   ;;  %s1994_s2 = inlined_call_operand.vmem [shape: f32[2,1], index: 2, kind: input, shape index: {}]   ;;  %s1995_s3 = inlined_call_operand.vmem [shape: bf16[16,2], index: 3, kind: input, shape index: {}]   ;;  %s1996_s4 = inlined_call_operand.vmem [shape: f32[16,1], index: 4, kind: input, shape index: {}]   ;;  %s1997_s5 = inlined_call_operand.hbm [shape: bf16[256,256], index: 5, kind: input, shape index: {}]   ;;  %s1998_s6 = inlined_call_operand.hbm [shape: bf16[256,256], index: 6, kind: input, shape index: {}]   ;;  %s1999_s7 = inlined_call_operand.<no memory space> [shape: f32[1], index: 7, kind: input, shape index: {}]   ;;  %s2000_s8 = inlined_call_operand.hbm [shape: f32[2,16,256], index: 8, kind: output, shape index: {}]  }
   0x1   :  { %13 = sst [smem:[#allocation2]] %s1999_s7 }
   0x2   :  { %14 = vsyncpa [#allocation4], 0 }
   0x3   :  { %16 = vsyncpa [#allocation4 + $0x1], 0 }
   0x4   :  { %17 = vsyncpa [#allocation7], 0 }
   0x5   :  { %18 = vsyncpa [#allocation5], 0 }
   0x6   :  { %20 = vsyncpa [#allocation5 + $0x1], 0  ;;  %s1691_s29 = smov 0   ;;  %s1693_s30 = smov 0  }
   0x7   :  { %s1695_s9 = smov 0   ;;  %s1697_s10 = smov 0  }
   0x8 LB: > { %s1712_s7 = sadd.s32 4294967295, %s1627_s10   ;;  %s1172_s11 = sadd.s32 4294967294, %s1627_s10   ;;  %s1627_s10 = sphi %s1697_s10, %s2020_s10   ;;  %s1623_s9 = sphi %s1695_s9, %s2019_s9   ;;  %s1619_s30 = sphi %s1693_s30, %s2018_s30   ;;  %s1615_s29 = sphi %s1691_s29, %s2017_s29  }
   0x9   : > { %p46_p0 = scmp.ne.s32.totalorder %s1619_s30, %s1615_s29  ;;  %p2001_p1 = scmp.eq.s32.totalorder %s1712_s7, 0 }
   0xa   : > { %p223_p3 = scmp.eq.s32.totalorder %s1172_s11, 1  ;;  %p1173_p5 = scmp.ge.s32.totalorder %s1627_s10, 1 }
   0xb   : > { %p1721_p4 = por %p2001_p1, %p46_p0  ;;  %p230_p7 = scmp.lt.s32.totalorder %s1627_s10, 3 }
   0xc   : > { %p1726_p6 = por %p223_p3, %p46_p0  ;;  %s1629_s15 = smov [#allocation6]  }
   0xd   : > { %s2004_s12 = scalar_select %p1721_p4, 1, 0 }
   0xe   : > { %s2005_s13 = scalar_select %p1726_p6, 1, 0 }
   0xf   : > { %p1731_p8 = pnand %p1173_p5, %p230_p7  ;;  %s254_s16 = sshll.u32 %s1629_s15, 4  ;;  %s1735_s16 = int_to_ptr.vmem [resolvable:$true] %s254_s16 }
  0x10   : > { %s1630_s18 = smov [#allocation8]   ;;  %s1471_s22 = scalar_lea.hbm %s1997_s5, 4096 }
  0x11   : > { %p1291_p9 = pneg %p1731_p8  ;;  %s267_s19 = sshll.u32 %s1630_s18, 4  ;;  %s1746_s19 = int_to_ptr.vmem [resolvable:$true] %s267_s19 }
  0x12   : > { %p1472_p12 = scmp.ne.s32.totalorder %s1997_s5, %s1471_s22  ;;  %p1478_p5 = scmp.lt.u32.totalorder %s1471_s22, %s1997_s5 }
  0x13   : > { %p1742_p11 = pnand %p1291_p9, %p2001_p1 }
  0x15   : > { %p1473_p13 = pneg %p1742_p11 }
  0x17   : > { %p1474_p0 = pnand %p1473_p13, %p1472_p12 }
  0x19   : > { %p1475_p3 = pneg %p1474_p0 }
  0x1b   : > { %p1480_p7 = pnand %p1478_p5, %p1475_p3 }
  0x1d   : > { %1483 = shalt.err (!%p1480_p7)
}
  0x1e   : > { %s1484_s27 = scalar_lea.vmem %s1735_s16, 4096  ;;  %p1492_p2 = scmp.lt.s32.totalorder %s1735_s16, %s1735_s16 }
  0x1f   : > { %p1485_p9 = scmp.ne.s32.totalorder %s1735_s16, %s1484_s27  ;;  %p1493_p12 = scmp.lt.s32.totalorder %s1484_s27, %s1484_s27 }
  0x21   : > { %p1487_p10 = pnand %p1485_p9, %p1473_p13  ;;  %p1494_p0 = por %p1493_p12, %p1492_p2 }
  0x23   : > { %p1488_p1 = pneg %p1487_p10 }
  0x25   : > { %p1495_p6 = pnand %p1494_p0, %p1488_p1 }
  0x27   : > { %1498 = shalt.err (!%p1495_p6)
}
  0x28   : > { %s1631_s28 = smov 128   ;;  %s1632_s11 = smov 8  }
  0x29   : > { %1294 = dma.hbm_to_vmem [thread:$0]  (!%p1742_p11), %s1997_s5, 4096, %s1735_s16, [#allocation7], %s1631_s28, %s1631_s28, %s1632_s11  }
  0x2a   : > { %s1499_s22 = scalar_lea.hbm %s1998_s6, 4096 }
  0x2b   : > { %p1500_p2 = scmp.ne.s32.totalorder %s1998_s6, %s1499_s22  ;;  %p1506_p10 = scmp.lt.u32.totalorder %s1499_s22, %s1998_s6 }
  0x2d   : > { %p1502_p1 = pnand %p1500_p2, %p1473_p13 }
  0x2f   : > { %p1503_p6 = pneg %p1502_p1 }
  0x31   : > { %p1508_p3 = pnand %p1506_p10, %p1503_p6 }
  0x33   : > { %1511 = shalt.err (!%p1508_p3)
}
  0x34   : > { %s1512_s16 = scalar_lea.vmem %s1746_s19, 4096  ;;  %p1520_p12 = scmp.lt.s32.totalorder %s1746_s19, %s1746_s19 }
  0x35   : > { %p1513_p5 = scmp.ne.s32.totalorder %s1746_s19, %s1512_s16  ;;  %p1521_p0 = scmp.lt.s32.totalorder %s1512_s16, %s1512_s16 }
  0x37   : > { %p1515_p7 = pnand %p1513_p5, %p1473_p13  ;;  %p1522_p2 = por %p1521_p0, %p1520_p12 }
  0x39   : > { %p1516_p9 = pneg %p1515_p7 }
  0x3b   : > { %p1523_p1 = pnand %p1522_p2, %p1516_p9 }
  0x3d   : > { %1526 = shalt.err (!%p1523_p1)
}
  0x3e   : > { %1297 = dma.hbm_to_vmem [thread:$0]  (!%p1742_p11), %s1998_s6, 4096, %s1746_s19, [#allocation7], %s1631_s28, %s1631_s28, %s1632_s11  }
  0x3f   : > { %s1801_s18 = sadd.s32 1, %s1627_s10   ;;  %s33_s17 = sadd.s32 1, %s1623_s9 }
  0x40   : > { %s30_s20 = ssub.s32 %s1627_s10, %s1801_s18  ;;  %p40_p13 = scmp.ne.s32.totalorder %s1623_s9, %s1619_s30 }
  0x41   : > { %p31_p6 = scmp.eq.s32.totalorder %s30_s20, 0  ;;  %p41_p10 = scmp.eq.s32.totalorder %s1627_s10, 0 }
  0x42   : > { %p2008_p3 = scmp.eq.s32.totalorder %s1712_s7, 1  ;;  %p1308_p7 = scmp.lt.s32.totalorder %s1627_s10, 2 }
  0x43   : > { %s1817_s22 = scalar_select %p31_p6, %s1623_s9, %s33_s17  }
  0x44   : > { %p1811_p5 = por %p2008_p3, %p40_p13  ;;  %p42_p9 = por %p41_p10, %p40_p13 }
  0x45   : > { %s284_s23 = sand.u32 1, %s1623_s9   ;;  %s1261_s19 = sshll.u32 %s1627_s10, 9 }
  0x46   : > { %s2009_s21 = scalar_select %p1811_p5, 1, 0 }
  0x47   : > { %s1177_s24 = sshll.u32 %s284_s23, 5  ;;  %s1824_s25 = scalar_lea.hbm %s1992_s0, %s1261_s19 }
  0x48   : > { %s288_s26 = scalar_lea.vmem [#allocation3], %s1177_s24  ;;  %p1828_p11 = pnand %p1308_p7, %p42_p9 }
  0x49   : > { %s295_s16 = sshll.u32 %s288_s26, 4  ;;  %s1832_s15 = scalar_lea.sflag [#allocation4], %s284_s23  ;;  %s1826_s16 = int_to_ptr.vmem [resolvable:$true] %s295_s16 }
  0x4a   : > { %s1527_s17 = scalar_lea.hbm %s1824_s25, 512  ;;  %p1529_p0 = pneg %p1828_p11 }
  0x4b   : > { %p1528_p12 = scmp.ne.s32.totalorder %s1824_s25, %s1527_s17  ;;  %s1532_s19 = scalar_lea.hbm %s1992_s0, 1024 }
  0x4c   : > { %p1533_p13 = scmp.lt.u32.totalorder %s1824_s25, %s1992_s0  ;;  %p1534_p6 = scmp.lt.u32.totalorder %s1532_s19, %s1527_s17 }
  0x4d   : > { %p1530_p2 = pnand %p1529_p0, %p1528_p12  ;;  %p1536_p3 = scmp.lt.u32.totalorder %s1527_s17, %s1824_s25 }
  0x4e   : > { %p1535_p10 = por %p1534_p6, %p1533_p13 }
  0x4f   : > { %p1531_p1 = pneg %p1530_p2 }
  0x50   : > { %p1537_p7 = por %p1536_p3, %p1535_p10 }
  0x52   : > { %p1538_p9 = pnand %p1537_p7, %p1531_p1 }
  0x54   : > { %1541 = shalt.err (!%p1538_p9)
}
  0x55   : > { %s1542_s23 = scalar_lea.vmem %s1826_s16, 512  ;;  %s1633_s26 = smov [#allocation3]  }
  0x56   : > { %p1543_p12 = scmp.ne.s32.totalorder %s1826_s16, %s1542_s23  ;;  %s1547_s20 = sshll.u32 %s1633_s26, 4  ;;  %s1548_s20 = int_to_ptr.vmem [resolvable:$false] %s1547_s20 }
  0x57   : > { %s1549_s24 = scalar_lea.vmem %s1548_s20, 1024  ;;  %p1550_p4 = scmp.lt.s32.totalorder %s1826_s16, %s1548_s20 }
  0x58   : > { %p1545_p2 = pnand %p1543_p12, %p1529_p0  ;;  %p1551_p13 = scmp.lt.s32.totalorder %s1549_s24, %s1542_s23 }
  0x5a   : > { %p1546_p5 = pneg %p1545_p2  ;;  %p1552_p6 = por %p1551_p13, %p1550_p4 }
  0x5c   : > { %p1553_p10 = pnand %p1552_p6, %p1546_p5 }
  0x5e   : > { %1556 = shalt.err (!%p1553_p10)
}
  0x5f   : > { %s1634_s17 = smov 256   ;;  %s1635_s19 = smov 16  }
  0x60   : > { %1301 = dma.hbm_to_vmem [thread:$0]  (!%p1828_p11), %s1824_s25, 512, %s1826_s16, %s1832_s15, %s1634_s17, %s1634_s17, %s1635_s19  }
  0x61   : > { %307 = sbr.rel (%p1731_p8) target bundleno = 1259 (0x4eb), region = 52  ;;  %s1863_s28 = sand.u32 (!%p1731_p8), 1, %s1619_s30  }
  0x62   : > { %s1181_s11 = sshll.u32 (!%p1731_p8), %s1863_s28, 5  ;;  %s310_s23 = scalar_lea.sflag (!%p1731_p8), [#allocation4], %s1863_s28 }
  0x63   : > { %s313_s26 = scalar_lea.vmem (!%p1731_p8), [#allocation3], %s1181_s11  ;;  %p2011_p4 = scmp.ne.s32.totalorder (!%p1731_p8), %s2004_s12, 0 }
  0x68   : > { %1602 = dma.done.wait (%p2011_p4), %s310_s23, 512  }
  0x69   : > { %1604 = vsyncadd (%p2011_p4), %s310_s23, 4294966784  ;;  %p2012_p5 = scmp.eq.s32.totalorder %s1712_s7, 0 }
  0x6b   : > { %1606 = dma.done.wait (%p2012_p5), [#allocation7], 8192   ;;  %p2013_p8 = pmov %p2012_p5 }
  0x6c   : > { %v1877_v0 = vld [vmem:[%s313_s26] sm:$0xff]  ;;  %v1879_v1 = vld [vmem:[%s313_s26 + $0x8] sm:$0xff]  ;;  %v1881_v2 = vld [vmem:[%s313_s26 + $0x10] sm:$0xff]  ;;  %v1636_v8 = vmov 0.0   ;;  %vm1637_vm0 = vmmov 0   ;;  %v1638_v10 = vmov 0  }
  0x6d   : > { %1608 = vsyncadd (%p2013_p8), [#allocation7], 4294959104  ;;  %v359_v3 = vadd.f32 %v1879_v1, %v1877_v0  ;;  %v367_v4 = vmax.f32 %v1877_v0, %v1879_v1  ;;  %v1887_v5 = vld [vmem:[%s313_s26 + $0x18] sm:$0xff]  ;;  %1267 = vmatprep.subr.bf16.mxu0 %v1636_v8  ;;  %1273 = vmatprep.subr.bf16.mxu1 %v1636_v8  ;;  %v378_v9 = vld [vmem:[%s1994_s2] sm:$0x3]  ;;  %vm373_vm1 = vcmask 7168  }
  0x6e   : > { %v362_v6 = vadd.f32 %v1887_v5, %v1881_v2  ;;  %v370_v7 = vmax.f32 %v1881_v2, %v1887_v5  ;;  %1269 = vmatprep.mubr.msk.bf16.mxu0 %vm1637_vm0, %v1636_v8  ;;  %1275 = vmatprep.mubr.msk.bf16.mxu1 %vm1637_vm0, %v1636_v8  ;;  %v377_v20 = vld [vmem:[%s1993_s1] sm:$0x1]  ;;  %vm384_vm2 = vcmask 130048   ;;  %v433_v22 = vld [vmem:[%s1996_s4 + $0x8] sm:$0xff]  ;;  %vm453_vm3 = vcmask 1040384   ;;  %s1639_s23 = smov 127  }
  0x6f   : > { %360 = vadd.xlane.f32.xlu0 %v359_v3  ;;  %368 = vmax.xlane.f32.xlu1 %v367_v4  ;;  %v432_v21 = vld [vmem:[%s1996_s4] sm:$0xff]  ;;  %vm449_vm4 = vcmask 15360   ;;  %v1367_v45 = vld [vmem:[#allocation8 + $0x14] ss:$8 sps:$4 sm:$0xff]   ;;  %v1365_v47 = vld [vmem:[#allocation8 + $0x10] ss:$8 sps:$4 sm:$0xff]  }
  0x70   : > { %1356 = vset.pattern.permute.xlu0 %v1638_v10  ;;  %1357 = vset.pattern.permute.xlu1 %v1638_v10  ;;  %v1358_v32 = vld [vmem:[%s1995_s3] sm:$0xff]   ;;  %v1370_v46 = vld [vmem:[#allocation6 + $0x14] ss:$8 sps:$4 sm:$0xff]   ;;  %v1368_v48 = vld [vmem:[#allocation6 + $0x10] ss:$8 sps:$4 sm:$0xff]   ;;  %s1034_s26 = sld [smem:[#allocation2]] }
  0x71   : > { %v1359_v41 = vld [vmem:[#allocation8] ss:$8 sps:$4 sm:$0xff]   ;;  %v1361_v42 = vld [vmem:[#allocation8 + $0x4] ss:$8 sps:$4 sm:$0xff]   ;;  %v1379_v53 = vld [vmem:[#allocation8 + $0x34] ss:$8 sps:$4 sm:$0xff]  }
  0x72   : > { %v1362_v43 = vld [vmem:[#allocation6] ss:$8 sps:$4 sm:$0xff]   ;;  %v1364_v44 = vld [vmem:[#allocation6 + $0x4] ss:$8 sps:$4 sm:$0xff]   ;;  %v1382_v54 = vld [vmem:[#allocation6 + $0x34] ss:$8 sps:$4 sm:$0xff]  }
  0x73   : > { %363 = vadd.xlane.f32.xlu0 %v362_v6  ;;  %371 = vmax.xlane.f32.xlu1 %v370_v7  ;;  %v1373_v49 = vld [vmem:[#allocation8 + $0x24] ss:$8 sps:$4 sm:$0xff]   ;;  %v1371_v51 = vld [vmem:[#allocation8 + $0x20] ss:$8 sps:$4 sm:$0xff]   ;;  %v1377_v55 = vld [vmem:[#allocation8 + $0x30] ss:$8 sps:$4 sm:$0xff]  }
  0x74   : > { %v1376_v50 = vld [vmem:[#allocation6 + $0x24] ss:$8 sps:$4 sm:$0xff]   ;;  %v1374_v52 = vld [vmem:[#allocation6 + $0x20] ss:$8 sps:$4 sm:$0xff]   ;;  %v1380_v56 = vld [vmem:[#allocation6 + $0x30] ss:$8 sps:$4 sm:$0xff]  }
  0x75   : > { %v1385_v57 = vld [vmem:[#allocation8 + $0x44] ss:$8 sps:$4 sm:$0xff]   ;;  %v1383_v59 = vld [vmem:[#allocation8 + $0x40] ss:$8 sps:$4 sm:$0xff]   ;;  %v1391_v61 = vld [vmem:[#allocation8 + $0x54] ss:$8 sps:$4 sm:$0xff]  }
  0x76   : > { %v1388_v58 = vld [vmem:[#allocation6 + $0x44] ss:$8 sps:$4 sm:$0xff]   ;;  %v1386_v60 = vld [vmem:[#allocation6 + $0x40] ss:$8 sps:$4 sm:$0xff]   ;;  %v1394_v62 = vld [vmem:[#allocation6 + $0x54] ss:$8 sps:$4 sm:$0xff]  }
  0x77   : > { %v1389_v63 = vld [vmem:[#allocation8 + $0x50] ss:$8 sps:$4 sm:$0xff]   ;;  %v1397_v4 = vld [vmem:[#allocation8 + $0x64] ss:$8 sps:$4 sm:$0xff]   ;;  %v1395_v7 = vld [vmem:[#allocation8 + $0x60] ss:$8 sps:$4 sm:$0xff]  }
  0x78   : > { %v1392_v3 = vld [vmem:[#allocation6 + $0x50] ss:$8 sps:$4 sm:$0xff]   ;;  %v1400_v6 = vld [vmem:[#allocation6 + $0x64] ss:$8 sps:$4 sm:$0xff]   ;;  %v1398_v8 = vld [vmem:[#allocation6 + $0x60] ss:$8 sps:$4 sm:$0xff]  }
  0x79   : > { %v1406_v10 = vld [vmem:[#allocation6 + $0x74] ss:$8 sps:$4 sm:$0xff]   ;;  %s1262_s12 = sshll.u32 %s1712_s7, 9  ;;  %s353_s14 = scalar_lea.vmem [#allocation9], %s1181_s11 }
  0x7a   : > { %s1080_s25 = sshll.u32 %s353_s14, 4  ;;  %s1944_s15 = scalar_lea.hbm %s2000_s8, %s1262_s12  ;;  %s1946_s25 = int_to_ptr.vmem [resolvable:$true] %s1080_s25 }
  0x7b   : > { %s1067_s7 = scalar_lea.sflag [#allocation5], %s1863_s28  ;;  %s1557_s11 = scalar_lea.vmem %s1946_s25, 512 }
  0x7c   : > { %p1558_p11 = scmp.ne.s32.totalorder %s1946_s25, %s1557_s11  ;;  %p2014_p0 = scmp.ne.s32.totalorder %s2009_s21, 0 }
  0x7d   : > { %s1640_s20 = smov [#allocation9]  }
  0x7e   : > { %p1559_p1 = pnand %p1558_p11, %p2014_p0  ;;  %s1561_s24 = sshll.u32 %s1640_s20, 4  ;;  %s1562_s24 = int_to_ptr.vmem [resolvable:$false] %s1561_s24 }
  0x7f   : > { %s1563_s17 = scalar_lea.vmem %s1562_s24, 1024  ;;  %p1564_p7 = scmp.lt.s32.totalorder %s1946_s25, %s1562_s24 }
  0x80   : > { %p1560_p3 = pneg %p1559_p1  ;;  %p1565_p9 = scmp.lt.s32.totalorder %s1563_s17, %s1557_s11 }
  0x82   : > { %p1566_p12 = por %p1565_p9, %p1564_p7 }
  0x84   : > { %436 = vperm.xlu1 %1357, %v432_v21   ;;  %v1421_v21 = vld [vmem:[#allocation8 + $0xa4] ss:$8 sps:$4 sm:$0xff]   ;;  %p1567_p2 = pnand %p1566_p12, %p1560_p3 }
  0x88   : > { %441 = vperm.xlu1 %1357, %v433_v22   ;;  %v1419_v22 = vld [vmem:[#allocation8 + $0xa0] ss:$8 sps:$4 sm:$0xff]  }
  0x89   : > { %381 = vperm.xlu0 %1356, %v378_v9   ;;  %v1403_v9 = vld [vmem:[#allocation8 + $0x74] ss:$8 sps:$4 sm:$0xff]  }
  0xfc   : > { %v361_v11 = vpop.xlane.xlu0 %360  ;;  %v369_v12 = vpop.xlane.xlu1 %368 }
  0xfd   : > { %v365_v13 = vmul.f32 0.00390625, %v361_v11  ;;  %v1401_v11 = vld [vmem:[#allocation8 + $0x70] ss:$8 sps:$4 sm:$0xff]  }
  0xff   : > { %v374_v17 = vsel %vm373_vm1, %v365_v13, %v369_v12  ;;  %v1404_v12 = vld [vmem:[#allocation6 + $0x70] ss:$8 sps:$4 sm:$0xff]   ;;  %v1409_v13 = vld [vmem:[#allocation8 + $0x84] ss:$8 sps:$4 sm:$0xff]  }
 0x100   : > { %v364_v14 = vpop.xlane.xlu0 %363  ;;  %v372_v15 = vpop.xlane.xlu1 %371 }
 0x101   : > { %v366_v16 = vmul.f32 0.00390625, %v364_v14  ;;  %v1412_v14 = vld [vmem:[#allocation6 + $0x84] ss:$8 sps:$4 sm:$0xff]  }
 0x103   : > { %v375_v18 = vsel %vm373_vm1, %v366_v16, %v372_v15  ;;  %v1407_v15 = vld [vmem:[#allocation8 + $0x80] ss:$8 sps:$4 sm:$0xff]  }
 0x104   : > { %v376_v19 = vpack.c.bf16 %v375_v18, %v374_v17  ;;  %v437_v33 = vpop.permute.xlu1 %436  ;;  %v1410_v16 = vld [vmem:[#allocation6 + $0x80] ss:$8 sps:$4 sm:$0xff]   ;;  %v1415_v17 = vld [vmem:[#allocation8 + $0x94] ss:$8 sps:$4 sm:$0xff]  }
 0x105   : > { %v1418_v18 = vld [vmem:[#allocation6 + $0x94] ss:$8 sps:$4 sm:$0xff]  }
 0x106   : > { %1268 = vmatpush3.bf16.msra.mxu0 %v376_v19  ;;  %v1413_v19 = vld [vmem:[#allocation8 + $0x90] ss:$8 sps:$4 sm:$0xff]  }
 0x107   : > { %792 = vmatprep.subr.bf16.mxu0 %v1361_v42  ;;  %v1431_v42 = vld [vmem:[#allocation8 + $0xc0] ss:$8 sps:$4 sm:$0xff]  }
 0x108   : > { %v382_v23 = vpop.permute.xlu0 %381  ;;  %v442_v39 = vpop.permute.xlu1 %441 }
 0x109   : > { %1270 = vmatmul.mubr.msk.bf16.vlgmr.msra.gmra.mrb[0].mxu0 %vm384_vm2, %v377_v20  ;;  %v1416_v20 = vld [vmem:[#allocation6 + $0x90] ss:$8 sps:$4 sm:$0xff]  }
 0x10a   : > { %793 = vmatpush1.bf16.msra.mxu0 %v1359_v41  ;;  %v1433_v41 = vld [vmem:[#allocation8 + $0xc4] ss:$8 sps:$4 sm:$0xff]  }
 0x10b   : > { %794 = vmatprep.subr.bf16.mxu0 %v1367_v45  ;;  %v1439_v45 = vld [vmem:[#allocation8 + $0xd4] ss:$8 sps:$4 sm:$0xff]  }
 0x10e   : > { %795 = vmatpush1.bf16.msra.mxu0 %v1365_v47  ;;  %v1442_v47 = vld [vmem:[#allocation6 + $0xd4] ss:$8 sps:$4 sm:$0xff]  }
 0x10f   : > { %796 = vmatprep.subr.bf16.mxu0 %v1373_v49  ;;  %v1445_v49 = vld [vmem:[#allocation8 + $0xe4] ss:$8 sps:$4 sm:$0xff]  }
 0x112   : > { %797 = vmatpush1.bf16.msra.mxu0 %v1371_v51  ;;  %v1446_v51 = vld [vmem:[#allocation6 + $0xe0] ss:$8 sps:$4 sm:$0xff]  }
 0x113   : > { %798 = vmatprep.subr.bf16.mxu0 %v1379_v53  ;;  %v1451_v53 = vld [vmem:[#allocation8 + $0xf4] ss:$8 sps:$4 sm:$0xff]  }
 0x116   : > { %799 = vmatpush1.bf16.msra.mxu0 %v1377_v55  ;;  %v1454_v55 = vld [vmem:[#allocation6 + $0xf4] ss:$8 sps:$4 sm:$0xff]  }
 0x117   : > { %800 = vmatprep.subr.bf16.mxu0 %v1385_v57 }
 0x11a   : > { %801 = vmatpush1.bf16.msra.mxu0 %v1383_v59 }
 0x11b   : > { %802 = vmatprep.subr.bf16.mxu0 %v1391_v61 }
 0x11e   : > { %803 = vmatpush1.bf16.msra.mxu0 %v1389_v63 }
 0x11f   : > { %804 = vmatprep.subr.bf16.mxu0 %v1397_v4 }
 0x122   : > { %805 = vmatpush1.bf16.msra.mxu0 %v1395_v7 }
 0x123   : > { %806 = vmatprep.subr.bf16.mxu0 %v1403_v9 }
 0x126   : > { %807 = vmatpush1.bf16.msra.mxu0 %v1401_v11 }
 0x127   : > { %808 = vmatprep.subr.bf16.mxu0 %v1409_v13 }
 0x12a   : > { %809 = vmatpush1.bf16.msra.mxu0 %v1407_v15 }
 0x12b   : > { %810 = vmatprep.subr.bf16.mxu0 %v1415_v17 }
 0x12e   : > { %811 = vmatpush1.bf16.msra.mxu0 %v1413_v19 }
 0x12f   : > { %812 = vmatprep.subr.bf16.mxu0 %v1421_v21 }
 0x132   : > { %813 = vmatpush1.bf16.msra.mxu0 %v1419_v22 }
 0x1dc   : > { %v422_v24 = vpop.f32.mrb[0].mxu0 }
 0x1dd   : > { %v423_v25 = vadd.f32 %v422_v24, %v382_v23  ;;  %v1271_v26 = vpop.f32.mrb[1].mxu0 }
 0x1de   : > { %v425_v27 = vpop.f32.mrb[2].mxu0 }
 0x1df   : > { %v428_v28 = vmax.f32 %v423_v25, 0.0  ;;  %v1272_v29 = vpop.f32.mrb[3].mxu0 }
 0x1e1   : > { %v429_v30 = vpack.c.bf16 %v428_v28, %v428_v28 }
 0x1e3   : > { %v455_v31 = vsel %vm453_vm3, %v429_v30, 0 }
 0x1e4   : > { %1274 = vmatpush3.bf16.msra.mxu1 %v455_v31 }
 0x1e5   : > { %993 = vmatprep.subr.bf16.mxu1 %v1364_v44  ;;  %v1434_v44 = vld [vmem:[#allocation6 + $0xc0] ss:$8 sps:$4 sm:$0xff]  }
 0x1e7   : > { %1276 = vmatmul.mubr.msk.bf16.vlgmr.msra.gmra.mrb[0].mxu1 %vm449_vm4, %v1358_v32 }
 0x1e8   : > { %994 = vmatpush1.bf16.msra.mxu1 %v1362_v43  ;;  %v1436_v43 = vld [vmem:[#allocation6 + $0xc4] ss:$8 sps:$4 sm:$0xff]  }
 0x1e9   : > { %995 = vmatprep.subr.bf16.mxu1 %v1370_v46  ;;  %v1437_v46 = vld [vmem:[#allocation8 + $0xd0] ss:$8 sps:$4 sm:$0xff]  }
 0x1ec   : > { %996 = vmatpush1.bf16.msra.mxu1 %v1368_v48  ;;  %v1440_v48 = vld [vmem:[#allocation6 + $0xd0] ss:$8 sps:$4 sm:$0xff]  }
 0x1ed   : > { %997 = vmatprep.subr.bf16.mxu1 %v1376_v50  ;;  %v1443_v50 = vld [vmem:[#allocation8 + $0xe0] ss:$8 sps:$4 sm:$0xff]  }
 0x1f0   : > { %998 = vmatpush1.bf16.msra.mxu1 %v1374_v52  ;;  %v1448_v52 = vld [vmem:[#allocation6 + $0xe4] ss:$8 sps:$4 sm:$0xff]  }
 0x1f1   : > { %999 = vmatprep.subr.bf16.mxu1 %v1382_v54  ;;  %v1449_v54 = vld [vmem:[#allocation8 + $0xf0] ss:$8 sps:$4 sm:$0xff]  }
 0x1f4   : > { %1000 = vmatpush1.bf16.msra.mxu1 %v1380_v56  ;;  %v1452_v56 = vld [vmem:[#allocation6 + $0xf0] ss:$8 sps:$4 sm:$0xff]  }
 0x1f5   : > { %1001 = vmatprep.subr.bf16.mxu1 %v1388_v58 }
 0x1f8   : > { %1002 = vmatpush1.bf16.msra.mxu1 %v1386_v60 }
 0x1f9   : > { %1003 = vmatprep.subr.bf16.mxu1 %v1394_v62 }
 0x1fc   : > { %1004 = vmatpush1.bf16.msra.mxu1 %v1392_v3 }
 0x1fd   : > { %1005 = vmatprep.subr.bf16.mxu1 %v1400_v6 }
 0x200   : > { %1006 = vmatpush1.bf16.msra.mxu1 %v1398_v8 }
 0x201   : > { %1007 = vmatprep.subr.bf16.mxu1 %v1406_v10 }
 0x204   : > { %1008 = vmatpush1.bf16.msra.mxu1 %v1404_v12 }
 0x205   : > { %1009 = vmatprep.subr.bf16.mxu1 %v1412_v14 }
 0x208   : > { %1010 = vmatpush1.bf16.msra.mxu1 %v1410_v16 }
 0x209   : > { %1011 = vmatprep.subr.bf16.mxu1 %v1418_v18 }
 0x20c   : > { %1012 = vmatpush1.bf16.msra.mxu1 %v1416_v20 }
 0x2ba   : > { %v491_v34 = vpop.f32.mrb[0].mxu1 }
 0x2bb   : > { %v1908_v35 = vadd.f32 %v491_v34, %v437_v33  ;;  %v1277_v36 = vpop.f32.mrb[1].mxu1  ;;  %v1424_v34 = vld [vmem:[#allocation6 + $0xa4] ss:$8 sps:$4 sm:$0xff]  }
 0x2bc   : > { %v494_v37 = vpop.f32.mrb[2].mxu1  ;;  %v1422_v36 = vld [vmem:[#allocation6 + $0xa0] ss:$8 sps:$4 sm:$0xff]   ;;  %1013 = vmatprep.subr.bf16.mxu1 %v1424_v34 }
 0x2bd   : > { %500 = vrot.lane.b32.xlu1 %v1908_v35, %s1639_s23  ;;  %v1278_v38 = vpop.f32.mrb[3].mxu1  ;;  %v1911_v40 = vadd.f32 %v494_v37, %v442_v39  ;;  %v1425_v37 = vld [vmem:[#allocation8 + $0xb0] ss:$8 sps:$4 sm:$0xff]   ;;  %1014 = vmatpush1.bf16.msra.mxu1 %v1422_v36  ;;  %v1430_v39 = vld [vmem:[#allocation6 + $0xb4] ss:$8 sps:$4 sm:$0xff]  }
 0x2be   : > { %v1427_v38 = vld [vmem:[#allocation8 + $0xb4] ss:$8 sps:$4 sm:$0xff]   ;;  %1015 = vmatprep.subr.bf16.mxu1 %v1430_v39 }
 0x2bf   : > { %814 = vmatprep.subr.bf16.mxu0 %v1427_v38  ;;  %v1035_v38 = vstv %s1034_s26 }
 0x2c0   : > { %815 = vmatpush1.bf16.msra.mxu0 %v1425_v37 }
 0x2c1   : > { %502 = vrot.lane.b32.xlu1 %v1911_v40, %s1639_s23  ;;  %816 = vmatprep.subr.bf16.mxu0 %v1433_v41 }
 0x2c4   : > { %817 = vmatpush1.bf16.msra.mxu0 %v1431_v42 }
 0x2c5   : > { %818 = vmatprep.subr.bf16.mxu0 %v1439_v45 }
 0x2c8   : > { %819 = vmatpush1.bf16.msra.mxu0 %v1437_v46 }
 0x2c9   : > { %820 = vmatprep.subr.bf16.mxu0 %v1445_v49 }
 0x2cc   : > { %821 = vmatpush1.bf16.msra.mxu0 %v1443_v50 }
 0x2cd   : > { %822 = vmatprep.subr.bf16.mxu0 %v1451_v53 }
 0x2d0   : > { %823 = vmatpush1.bf16.msra.mxu0 %v1449_v54 }
 0x32f   : > { %v501_v23 = vpop.permute.xlu1 %500 }
 0x330   : > { %v506_v24 = vadd.f32 %v501_v23, %v1908_v35 }
 0x332   : > { %v1188_v25 = vmul.f32 -1.442695, %v506_v24 }
 0x333   : > { %v503_v26 = vpop.permute.xlu1 %502 }
 0x334   : > { %1455 = vpow2.f32 %v1188_v25  ;;  %v507_v27 = vadd.f32 %v503_v26, %v1911_v40  ;;  %v1428_v40 = vld [vmem:[#allocation6 + $0xb0] ss:$8 sps:$4 sm:$0xff]  }
 0x335   : > { %1016 = vmatpush1.bf16.msra.mxu1 %v1428_v40 }
 0x336   : > { %v1189_v28 = vmul.f32 -1.442695, %v507_v27  ;;  %1017 = vmatprep.subr.bf16.mxu1 %v1436_v43 }
 0x338   : > { %1457 = vpow2.f32 %v1189_v28 }
 0x339   : > { %1018 = vmatpush1.bf16.msra.mxu1 %v1434_v44 }
 0x33a   : > { %1019 = vmatprep.subr.bf16.mxu1 %v1442_v47 }
 0x33d   : > { %1020 = vmatpush1.bf16.msra.mxu1 %v1440_v48 }
 0x33e   : > { %v1456_v29 = vpop.eup %1455  ;;  %1021 = vmatprep.subr.bf16.mxu1 %v1448_v52 }
 0x33f   : > { %v514_v30 = vadd.f32 1.0, %v1456_v29 }
 0x341   : > { %1459 = vrcp.f32 %v514_v30  ;;  %1022 = vmatpush1.bf16.msra.mxu1 %v1446_v51  ;;  %v1050_v51 = vlaneseq }
 0x342   : > { %v1458_v31 = vpop.eup %1457  ;;  %1023 = vmatprep.subr.bf16.mxu1 %v1454_v55 }
 0x343   : > { %v515_v32 = vadd.f32 1.0, %v1458_v31  ;;  %v1051_v53 = vshrl.u32 %v1050_v51, 7 }
 0x345   : > { %1461 = vrcp.f32 %v515_v32  ;;  %1024 = vmatpush1.bf16.msra.mxu1 %v1452_v56  ;;  %v1052_v54 = vsub.s32 0, %v1051_v53 }
 0x34b   : > { %v1460_v33 = vpop.eup %1459 }
 0x34c   : > { %522 = vperm.xlu1 %1357, %v1460_v33  }
 0x34f   : > { %v1462_v35 = vpop.eup %1461 }
 0x350   : > { %527 = vperm.xlu1 %1357, %v1462_v35  }
 0x3cb   : > { %v523_v57 = vpop.permute.xlu1 %522 }
 0x3cc   : > { %v1917_v59 = vmul.f32 %v523_v57, %v1877_v0  ;;  %v1920_v60 = vmul.f32 %v523_v57, %v1879_v1 }
 0x3cf   : > { %v528_v58 = vpop.permute.xlu1 %527 }
 0x3d0   : > { %v1923_v61 = vmul.f32 %v528_v58, %v1881_v2  ;;  %v1926_v62 = vmul.f32 %v528_v58, %v1887_v5 }
 0x3d2   : > { %v534_v63 = vadd.f32 %v1923_v61, %v1917_v59  ;;  %v541_v3 = vadd.f32 %v1926_v62, %v1920_v60  ;;  %v550_v4 = vmax.f32 %v1917_v59, %v1923_v61  ;;  %v557_v0 = vmax.f32 %v1920_v60, %v1926_v62 }
 0x3d4   : > { %v535_v1 = vrot.slane %v534_v63, 4  ;;  %v542_v6 = vrot.slane %v541_v3, 4  ;;  %v551_v7 = vrot.slane %v550_v4, 4  ;;  %v558_v2 = vrot.slane %v557_v0, 4 }
 0x3d6   : > { %v536_v8 = vadd.f32 %v535_v1, %v534_v63  ;;  %v543_v9 = vadd.f32 %v542_v6, %v541_v3  ;;  %v552_v5 = vmax.f32 %v550_v4, %v551_v7  ;;  %v559_v10 = vmax.f32 %v557_v0, %v558_v2 }
 0x3d8   : > { %v537_v11 = vrot.slane %v536_v8, 2  ;;  %v553_v12 = vrot.slane %v552_v5, 2  ;;  %v560_v13 = vrot.slane %v559_v10, 2  ;;  %v544_v14 = vrot.slane %v543_v9, 2 }
 0x3da   : > { %v538_v15 = vadd.f32 %v537_v11, %v536_v8  ;;  %v554_v16 = vmax.f32 %v552_v5, %v553_v12  ;;  %v561_v17 = vmax.f32 %v559_v10, %v560_v13  ;;  %v545_v18 = vadd.f32 %v544_v14, %v543_v9 }
 0x3dc   : > { %v562_v19 = vrot.slane %v561_v17, 1  ;;  %v555_v20 = vrot.slane %v554_v16, 1  ;;  %v546_v21 = vrot.slane %v545_v18, 1  ;;  %v539_v22 = vrot.slane %v538_v15, 1 }
 0x3de   : > { %v563_v23 = vmax.f32 %v561_v17, %v562_v19  ;;  %v556_v24 = vmax.f32 %v554_v16, %v555_v20  ;;  %v547_v25 = vadd.f32 %v546_v21, %v545_v18  ;;  %v540_v26 = vadd.f32 %v539_v22, %v538_v15 }
 0x3e0   : > { %v567_v27 = vpack.c.bf16 %v563_v23, %v563_v23  ;;  %v566_v28 = vpack.c.bf16 %v556_v24, %v556_v24  ;;  %v549_v29 = vmul.f32 0.0625, %v547_v25  ;;  %v548_v30 = vmul.f32 0.0625, %v540_v26 }
 0x3e2   : > { %824 = vmatprep.mubr.bf16.mxu0 %v567_v27  ;;  %v565_v31 = vpack.c.bf16 %v549_v29, %v549_v29  ;;  %v564_v32 = vpack.c.bf16 %v548_v30, %v548_v30 }
 0x3e3   : > { %825 = vmatmul.mubr.bf16.vlgmr.msra.gmra.mrb[4].mxu0 %v566_v28 }
 0x3e4   : > { %1025 = vmatprep.mubr.bf16.mxu1 %v565_v31 }
 0x3e5   : > { %1026 = vmatmul.mubr.bf16.vlgmr.msra.gmra.mrb[4].mxu1 %v564_v32 }
 0x4b6   : > { %v826_v33 = vpop.f32.mrb[4].mxu0 }
 0x4b7   : > { %v828_v34 = vpop.f32.mrb[5].mxu0 }
 0x4b8   : > { %v830_v36 = vpop.f32.mrb[6].mxu0  ;;  %v1027_v37 = vpop.f32.mrb[4].mxu1 }
 0x4b9   : > { %v1028_v35 = vadd.f32 %v1027_v37, %v826_v33  ;;  %v831_v39 = vpop.f32.mrb[7].mxu0  ;;  %v1029_v40 = vpop.f32.mrb[5].mxu1 }
 0x4ba   : > { %v1030_v41 = vadd.f32 %v1029_v40, %v828_v34  ;;  %v1031_v42 = vpop.f32.mrb[6].mxu1 }
 0x4bb   : > { %v1036_v43 = vadd.f32 %v1035_v38, %v1028_v35  ;;  %v1032_v44 = vpop.f32.mrb[7].mxu1 }
 0x4bc   : > { %v1037_v45 = vadd.f32 %v1035_v38, %v1030_v41 }
 0x4bd   : > { %v1254_v46 = vmul.f32 -1.442695, %v1036_v43 }
 0x4be   : > { %v1255_v47 = vmul.f32 -1.442695, %v1037_v45 }
 0x4bf   : > { %1463 = vpow2.f32 %v1254_v46 }
 0x4c0   : > { %1465 = vpow2.f32 %v1255_v47 }
 0x4c9   : > { %v1464_v48 = vpop.eup %1463 }
 0x4ca   : > { %v1466_v49 = vpop.eup %1465  ;;  %v1044_v50 = vadd.f32 1.0, %v1464_v48 }
 0x4cb   : > { %v1045_v52 = vadd.f32 1.0, %v1466_v49 }
 0x4cc   : > { %1467 = vrcp.f32 %v1044_v50 }
 0x4cd   : > { %1469 = vrcp.f32 %v1045_v52 }
 0x4d6   : > { %v1468_v55 = vpop.eup %1467 }
 0x4d7   : > { %v1470_v56 = vpop.eup %1469  ;;  %v1053_v57 = vrot.slane %v1468_v55, %v1052_v54 }
 0x4d8   : > { %v1057_v58 = vrot.slane %v1470_v56, %v1052_v54 }
 0x4d9   : > { %v1058_v63 = vmul.f32 %v1053_v57, %v1917_v59  ;;  %v1060_v3 = vmul.f32 %v1053_v57, %v1923_v61 }
 0x4da   : > { %v1059_v4 = vmul.f32 %v1057_v58, %v1920_v60  ;;  %v1061_v0 = vmul.f32 %v1057_v58, %v1926_v62 }
 0x4db   : > { %1062 = vst [vmem:[%s353_s14] sm:$0xff] %v1058_v63  ;;  %1064 = vst [vmem:[%s353_s14 + $0x10] sm:$0xff] %v1060_v3 }
 0x4dc   : > { %1063 = vst [vmem:[%s353_s14 + $0x8] sm:$0xff] %v1059_v4  ;;  %1065 = vst [vmem:[%s353_s14 + $0x18] sm:$0xff] %v1061_v0 }
 0x4dd   : > { %1570 = shalt.err (!%p1567_p2)
}
 0x4de   : > { %s1571_s19 = scalar_lea.hbm %s1944_s15, 512  ;;  %s1575_s12 = scalar_lea.hbm %s2000_s8, 1024 }
 0x4df   : > { %p1572_p13 = scmp.ne.s32.totalorder %s1944_s15, %s1571_s19  ;;  %p1576_p4 = scmp.lt.u32.totalorder %s1944_s15, %s2000_s8 }
 0x4e0   : > { %p1577_p5 = scmp.lt.u32.totalorder %s1575_s12, %s1571_s19  ;;  %p1579_p11 = scmp.lt.u32.totalorder %s1571_s19, %s1944_s15 }
 0x4e1   : > { %p1573_p6 = pnand %p1572_p13, %p2014_p0 }
 0x4e2   : > { %p1578_p8 = por %p1577_p5, %p1576_p4 }
 0x4e3   : > { %p1574_p10 = pneg %p1573_p6 }
 0x4e4   : > { %p1580_p1 = por %p1579_p11, %p1578_p8 }
 0x4e6   : > { %p1581_p3 = pnand %p1580_p1, %p1574_p10 }
 0x4e8   : > { %1584 = shalt.err (!%p1581_p3)
}
 0x4e9   : > { %s1641_s27 = smov 256   ;;  %s1642_s11 = smov 16  }
 0x4ea   : > { %1289 = dma.vmem_to_hbm [thread:$0]  (%p2014_p0), %s1946_s25, 512, %s1944_s15, %s1067_s7, %s1641_s27, %s1641_s27, %s1642_s11  }
 0x4eb PF: > { %s1095_s20 = sand.u32 1, %s1615_s29   ;;  %p2015_p7 = scmp.ne.s32.totalorder %s2005_s13, 0 }
 0x4ec   : > { %p2016_p9 = scmp.ge.s32.totalorder %s1627_s10, 2  ;;  %s1096_s24 = scalar_lea.sflag [#allocation5], %s1095_s20 }
 0x4ee   : > { %p1303_p12 = pnand %p2016_p9, %p2015_p7 }
 0x4f0   : > { %1610 = dma.done.wait (!%p1303_p12), %s1096_s24, 512  }
 0x4f1   : > { %1612 = vsyncadd (!%p1303_p12), %s1096_s24, 4294966784  ;;  %p23_p2 = scmp.ge.s32.totalorder %s1801_s18, 4   ;;  %s2017_s29 = smov %s1619_s30 }
 0x4f2   : > { %s2018_s30 = smov %s1623_s9  ;;  %s2019_s9 = smov %s1817_s22 }
 0x4f3   : > { %s2020_s10 = smov %s1801_s18  ;;  %25 = sbr.rel (!%p23_p2) target bundleno = 8 (0x8), region = 105 }
 0x4fa   :  { %1101 = vsyncpa [#allocation4], 1 }
 0x4fb   :  { %1103 = vsyncpa [#allocation4 + $0x1], 1 }
 0x4fc   :  { %1104 = vsyncpa [#allocation7], 1 }
 0x4fd   :  { %1105 = vsyncpa [#allocation5], 1 }
 0x4fe   :  { %1107 = vsyncpa [#allocation5 + $0x1], 1 }

// kernel: tpu_custom_call.1
= control target key start
LH: loop header
LB: loop body
LE: loop exit
PB: predicated region body
PF: predicated region fallthrough
CT: control target
= control target key end

     0   :  { %s1992_s0 = inlined_call_operand.hbm [shape: f32[2,16,256], index: 0, kind: input, shape index: {}]   ;;  %s1993_s1 = inlined_call_operand.vmem [shape: bf16[2,16], index: 1, kind: input, shape index: {}]   ;;  %s1994_s2 = inlined_call_operand.vmem [shape: f32[2,1], index: 2, kind: input, shape index: {}]   ;;  %s1995_s3 = inlined_call_operand.vmem [shape: bf16[16,2], index: 3, kind: input, shape index: {}]   ;;  %s1996_s4 = inlined_call_operand.vmem [shape: f32[16,1], index: 4, kind: input, shape index: {}]   ;;  %s1997_s5 = inlined_call_operand.hbm [shape: bf16[256,256], index: 5, kind: input, shape index: {}]   ;;  %s1998_s6 = inlined_call_operand.hbm [shape: bf16[256,256], index: 6, kind: input, shape index: {}]   ;;  %s1999_s7 = inlined_call_operand.<no memory space> [shape: f32[1], index: 7, kind: input, shape index: {}]   ;;  %s2000_s8 = inlined_call_operand.hbm [shape: f32[2,16,256], index: 8, kind: output, shape index: {}]  }
   0x1   :  { %13 = sst [smem:[#allocation2]] %s1999_s7 }
   0x2   :  { %14 = vsyncpa [#allocation4], 0 }
   0x3   :  { %16 = vsyncpa [#allocation4 + $0x1], 0 }
   0x4   :  { %17 = vsyncpa [#allocation7], 0 }
   0x5   :  { %18 = vsyncpa [#allocation5], 0 }
   0x6   :  { %20 = vsyncpa [#allocation5 + $0x1], 0  ;;  %s1691_s29 = smov 0   ;;  %s1693_s30 = smov 0  }
   0x7   :  { %s1695_s9 = smov 0   ;;  %s1697_s10 = smov 0  }
   0x8 LB: > { %s1712_s7 = sadd.s32 4294967295, %s1627_s10   ;;  %s1172_s11 = sadd.s32 4294967294, %s1627_s10   ;;  %s1627_s10 = sphi %s1697_s10, %s2020_s10   ;;  %s1623_s9 = sphi %s1695_s9, %s2019_s9   ;;  %s1619_s30 = sphi %s1693_s30, %s2018_s30   ;;  %s1615_s29 = sphi %s1691_s29, %s2017_s29  }
   0x9   : > { %p46_p0 = scmp.ne.s32.totalorder %s1619_s30, %s1615_s29  ;;  %p2001_p1 = scmp.eq.s32.totalorder %s1712_s7, 0 }
   0xa   : > { %p223_p3 = scmp.eq.s32.totalorder %s1172_s11, 1  ;;  %p1173_p5 = scmp.ge.s32.totalorder %s1627_s10, 1 }
   0xb   : > { %p1721_p4 = por %p2001_p1, %p46_p0  ;;  %p230_p7 = scmp.lt.s32.totalorder %s1627_s10, 3 }
   0xc   : > { %p1726_p6 = por %p223_p3, %p46_p0  ;;  %s1629_s15 = smov [#allocation6]  }
   0xd   : > { %s2004_s12 = scalar_select %p1721_p4, 1, 0 }
   0xe   : > { %s2005_s13 = scalar_select %p1726_p6, 1, 0 }
   0xf   : > { %p1731_p8 = pnand %p1173_p5, %p230_p7  ;;  %s254_s16 = sshll.u32 %s1629_s15, 4  ;;  %s1735_s16 = int_to_ptr.vmem [resolvable:$true] %s254_s16 }
  0x10   : > { %s1630_s18 = smov [#allocation8]   ;;  %s1471_s22 = scalar_lea.hbm %s1997_s5, 4096 }
  0x11   : > { %p1291_p9 = pneg %p1731_p8  ;;  %s267_s19 = sshll.u32 %s1630_s18, 4  ;;  %s1746_s19 = int_to_ptr.vmem [resolvable:$true] %s267_s19 }
  0x12   : > { %p1472_p12 = scmp.ne.s32.totalorder %s1997_s5, %s1471_s22  ;;  %p1478_p5 = scmp.lt.u32.totalorder %s1471_s22, %s1997_s5 }
  0x13   : > { %p1742_p11 = pnand %p1291_p9, %p2001_p1 }
  0x15   : > { %p1473_p13 = pneg %p1742_p11 }
  0x17   : > { %p1474_p0 = pnand %p1473_p13, %p1472_p12 }
  0x19   : > { %p1475_p3 = pneg %p1474_p0 }
  0x1b   : > { %p1480_p7 = pnand %p1478_p5, %p1475_p3 }
  0x1d   : > { %1483 = shalt.err (!%p1480_p7)
}
  0x1e   : > { %s1484_s27 = scalar_lea.vmem %s1735_s16, 4096  ;;  %p1492_p2 = scmp.lt.s32.totalorder %s1735_s16, %s1735_s16 }
  0x1f   : > { %p1485_p9 = scmp.ne.s32.totalorder %s1735_s16, %s1484_s27  ;;  %p1493_p12 = scmp.lt.s32.totalorder %s1484_s27, %s1484_s27 }
  0x21   : > { %p1487_p10 = pnand %p1485_p9, %p1473_p13  ;;  %p1494_p0 = por %p1493_p12, %p1492_p2 }
  0x23   : > { %p1488_p1 = pneg %p1487_p10 }
  0x25   : > { %p1495_p6 = pnand %p1494_p0, %p1488_p1 }
  0x27   : > { %1498 = shalt.err (!%p1495_p6)
}
  0x28   : > { %s1631_s28 = smov 128   ;;  %s1632_s11 = smov 8  }
  0x29   : > { %1294 = dma.hbm_to_vmem [thread:$0]  (!%p1742_p11), %s1997_s5, 4096, %s1735_s16, [#allocation7], %s1631_s28, %s1631_s28, %s1632_s11  }
  0x2a   : > { %s1499_s22 = scalar_lea.hbm %s1998_s6, 4096 }
  0x2b   : > { %p1500_p2 = scmp.ne.s32.totalorder %s1998_s6, %s1499_s22  ;;  %p1506_p10 = scmp.lt.u32.totalorder %s1499_s22, %s1998_s6 }
  0x2d   : > { %p1502_p1 = pnand %p1500_p2, %p1473_p13 }
  0x2f   : > { %p1503_p6 = pneg %p1502_p1 }
  0x31   : > { %p1508_p3 = pnand %p1506_p10, %p1503_p6 }
  0x33   : > { %1511 = shalt.err (!%p1508_p3)
}
  0x34   : > { %s1512_s16 = scalar_lea.vmem %s1746_s19, 4096  ;;  %p1520_p12 = scmp.lt.s32.totalorder %s1746_s19, %s1746_s19 }
  0x35   : > { %p1513_p5 = scmp.ne.s32.totalorder %s1746_s19, %s1512_s16  ;;  %p1521_p0 = scmp.lt.s32.totalorder %s1512_s16, %s1512_s16 }
  0x37   : > { %p1515_p7 = pnand %p1513_p5, %p1473_p13  ;;  %p1522_p2 = por %p1521_p0, %p1520_p12 }
  0x39   : > { %p1516_p9 = pneg %p1515_p7 }
  0x3b   : > { %p1523_p1 = pnand %p1522_p2, %p1516_p9 }
  0x3d   : > { %1526 = shalt.err (!%p1523_p1)
}
  0x3e   : > { %1297 = dma.hbm_to_vmem [thread:$0]  (!%p1742_p11), %s1998_s6, 4096, %s1746_s19, [#allocation7], %s1631_s28, %s1631_s28, %s1632_s11  }
  0x3f   : > { %s1801_s18 = sadd.s32 1, %s1627_s10   ;;  %s33_s17 = sadd.s32 1, %s1623_s9 }
  0x40   : > { %s30_s20 = ssub.s32 %s1627_s10, %s1801_s18  ;;  %p40_p13 = scmp.ne.s32.totalorder %s1623_s9, %s1619_s30 }
  0x41   : > { %p31_p6 = scmp.eq.s32.totalorder %s30_s20, 0  ;;  %p41_p10 = scmp.eq.s32.totalorder %s1627_s10, 0 }
  0x42   : > { %p2008_p3 = scmp.eq.s32.totalorder %s1712_s7, 1  ;;  %p1308_p7 = scmp.lt.s32.totalorder %s1627_s10, 2 }
  0x43   : > { %s1817_s22 = scalar_select %p31_p6, %s1623_s9, %s33_s17  }
  0x44   : > { %p1811_p5 = por %p2008_p3, %p40_p13  ;;  %p42_p9 = por %p41_p10, %p40_p13 }
  0x45   : > { %s284_s23 = sand.u32 1, %s1623_s9   ;;  %s1261_s19 = sshll.u32 %s1627_s10, 9 }
  0x46   : > { %s2009_s21 = scalar_select %p1811_p5, 1, 0 }
  0x47   : > { %s1177_s24 = sshll.u32 %s284_s23, 5  ;;  %s1824_s25 = scalar_lea.hbm %s1992_s0, %s1261_s19 }
  0x48   : > { %s288_s26 = scalar_lea.vmem [#allocation3], %s1177_s24  ;;  %p1828_p11 = pnand %p1308_p7, %p42_p9 }
  0x49   : > { %s295_s16 = sshll.u32 %s288_s26, 4  ;;  %s1832_s15 = scalar_lea.sflag [#allocation4], %s284_s23  ;;  %s1826_s16 = int_to_ptr.vmem [resolvable:$true] %s295_s16 }
  0x4a   : > { %s1527_s17 = scalar_lea.hbm %s1824_s25, 512  ;;  %p1529_p0 = pneg %p1828_p11 }
  0x4b   : > { %p1528_p12 = scmp.ne.s32.totalorder %s1824_s25, %s1527_s17  ;;  %s1532_s19 = scalar_lea.hbm %s1992_s0, 1024 }
  0x4c   : > { %p1533_p13 = scmp.lt.u32.totalorder %s1824_s25, %s1992_s0  ;;  %p1534_p6 = scmp.lt.u32.totalorder %s1532_s19, %s1527_s17 }
  0x4d   : > { %p1530_p2 = pnand %p1529_p0, %p1528_p12  ;;  %p1536_p3 = scmp.lt.u32.totalorder %s1527_s17, %s1824_s25 }
  0x4e   : > { %p1535_p10 = por %p1534_p6, %p1533_p13 }
  0x4f   : > { %p1531_p1 = pneg %p1530_p2 }
  0x50   : > { %p1537_p7 = por %p1536_p3, %p1535_p10 }
  0x52   : > { %p1538_p9 = pnand %p1537_p7, %p1531_p1 }
  0x54   : > { %1541 = shalt.err (!%p1538_p9)
}
  0x55   : > { %s1542_s23 = scalar_lea.vmem %s1826_s16, 512  ;;  %s1633_s26 = smov [#allocation3]  }
  0x56   : > { %p1543_p12 = scmp.ne.s32.totalorder %s1826_s16, %s1542_s23  ;;  %s1547_s20 = sshll.u32 %s1633_s26, 4  ;;  %s1548_s20 = int_to_ptr.vmem [resolvable:$false] %s1547_s20 }
  0x57   : > { %s1549_s24 = scalar_lea.vmem %s1548_s20, 1024  ;;  %p1550_p4 = scmp.lt.s32.totalorder %s1826_s16, %s1548_s20 }
  0x58   : > { %p1545_p2 = pnand %p1543_p12, %p1529_p0  ;;  %p1551_p13 = scmp.lt.s32.totalorder %s1549_s24, %s1542_s23 }
  0x5a   : > { %p1546_p5 = pneg %p1545_p2  ;;  %p1552_p6 = por %p1551_p13, %p1550_p4 }
  0x5c   : > { %p1553_p10 = pnand %p1552_p6, %p1546_p5 }
  0x5e   : > { %1556 = shalt.err (!%p1553_p10)
}
  0x5f   : > { %s1634_s17 = smov 256   ;;  %s1635_s19 = smov 16  }
  0x60   : > { %1301 = dma.hbm_to_vmem [thread:$0]  (!%p1828_p11), %s1824_s25, 512, %s1826_s16, %s1832_s15, %s1634_s17, %s1634_s17, %s1635_s19  }
  0x61   : > { %307 = sbr.rel (%p1731_p8) target bundleno = 1259 (0x4eb), region = 52  ;;  %s1863_s28 = sand.u32 (!%p1731_p8), 1, %s1619_s30  }
  0x62   : > { %s1181_s11 = sshll.u32 (!%p1731_p8), %s1863_s28, 5  ;;  %s310_s23 = scalar_lea.sflag (!%p1731_p8), [#allocation4], %s1863_s28 }
  0x63   : > { %s313_s26 = scalar_lea.vmem (!%p1731_p8), [#allocation3], %s1181_s11  ;;  %p2011_p4 = scmp.ne.s32.totalorder (!%p1731_p8), %s2004_s12, 0 }
  0x68   : > { %1602 = dma.done.wait (%p2011_p4), %s310_s23, 512  }
  0x69   : > { %1604 = vsyncadd (%p2011_p4), %s310_s23, 4294966784  ;;  %p2012_p5 = scmp.eq.s32.totalorder %s1712_s7, 0 }
  0x6b   : > { %1606 = dma.done.wait (%p2012_p5), [#allocation7], 8192   ;;  %p2013_p8 = pmov %p2012_p5 }
  0x6c   : > { %v1877_v0 = vld [vmem:[%s313_s26] sm:$0xff]  ;;  %v1879_v1 = vld [vmem:[%s313_s26 + $0x8] sm:$0xff]  ;;  %v1881_v2 = vld [vmem:[%s313_s26 + $0x10] sm:$0xff]  ;;  %v1636_v8 = vmov 0.0   ;;  %vm1637_vm0 = vmmov 0   ;;  %v1638_v10 = vmov 0  }
  0x6d   : > { %1608 = vsyncadd (%p2013_p8), [#allocation7], 4294959104  ;;  %v359_v3 = vadd.f32 %v1879_v1, %v1877_v0  ;;  %v367_v4 = vmax.f32 %v1877_v0, %v1879_v1  ;;  %v1887_v5 = vld [vmem:[%s313_s26 + $0x18] sm:$0xff]  ;;  %1267 = vmatprep.subr.bf16.mxu0 %v1636_v8  ;;  %1273 = vmatprep.subr.bf16.mxu1 %v1636_v8  ;;  %v378_v9 = vld [vmem:[%s1994_s2] sm:$0x3]  ;;  %vm373_vm1 = vcmask 7168  }
  0x6e   : > { %v362_v6 = vadd.f32 %v1887_v5, %v1881_v2  ;;  %v370_v7 = vmax.f32 %v1881_v2, %v1887_v5  ;;  %1269 = vmatprep.mubr.msk.bf16.mxu0 %vm1637_vm0, %v1636_v8  ;;  %1275 = vmatprep.mubr.msk.bf16.mxu1 %vm1637_vm0, %v1636_v8  ;;  %v377_v20 = vld [vmem:[%s1993_s1] sm:$0x1]  ;;  %vm384_vm2 = vcmask 130048   ;;  %v433_v22 = vld [vmem:[%s1996_s4 + $0x8] sm:$0xff]  ;;  %vm453_vm3 = vcmask 1040384   ;;  %s1639_s23 = smov 127  }
  0x6f   : > { %360 = vadd.xlane.f32.xlu0 %v359_v3  ;;  %368 = vmax.xlane.f32.xlu1 %v367_v4  ;;  %v432_v21 = vld [vmem:[%s1996_s4] sm:$0xff]  ;;  %vm449_vm4 = vcmask 15360   ;;  %v1367_v45 = vld [vmem:[#allocation8 + $0x14] ss:$8 sps:$4 sm:$0xff]   ;;  %v1365_v47 = vld [vmem:[#allocation8 + $0x10] ss:$8 sps:$4 sm:$0xff]  }
  0x70   : > { %1356 = vset.pattern.permute.xlu0 %v1638_v10  ;;  %1357 = vset.pattern.permute.xlu1 %v1638_v10  ;;  %v1358_v32 = vld [vmem:[%s1995_s3] sm:$0xff]   ;;  %v1370_v46 = vld [vmem:[#allocation6 + $0x14] ss:$8 sps:$4 sm:$0xff]   ;;  %v1368_v48 = vld [vmem:[#allocation6 + $0x10] ss:$8 sps:$4 sm:$0xff]   ;;  %s1034_s26 = sld [smem:[#allocation2]] }
  0x71   : > { %v1359_v41 = vld [vmem:[#allocation8] ss:$8 sps:$4 sm:$0xff]   ;;  %v1361_v42 = vld [vmem:[#allocation8 + $0x4] ss:$8 sps:$4 sm:$0xff]   ;;  %v1379_v53 = vld [vmem:[#allocation8 + $0x34] ss:$8 sps:$4 sm:$0xff]  }
  0x72   : > { %v1362_v43 = vld [vmem:[#allocation6] ss:$8 sps:$4 sm:$0xff]   ;;  %v1364_v44 = vld [vmem:[#allocation6 + $0x4] ss:$8 sps:$4 sm:$0xff]   ;;  %v1382_v54 = vld [vmem:[#allocation6 + $0x34] ss:$8 sps:$4 sm:$0xff]  }
  0x73   : > { %363 = vadd.xlane.f32.xlu0 %v362_v6  ;;  %371 = vmax.xlane.f32.xlu1 %v370_v7  ;;  %v1373_v49 = vld [vmem:[#allocation8 + $0x24] ss:$8 sps:$4 sm:$0xff]   ;;  %v1371_v51 = vld [vmem:[#allocation8 + $0x20] ss:$8 sps:$4 sm:$0xff]   ;;  %v1377_v55 = vld [vmem:[#allocation8 + $0x30] ss:$8 sps:$4 sm:$0xff]  }
  0x74   : > { %v1376_v50 = vld [vmem:[#allocation6 + $0x24] ss:$8 sps:$4 sm:$0xff]   ;;  %v1374_v52 = vld [vmem:[#allocation6 + $0x20] ss:$8 sps:$4 sm:$0xff]   ;;  %v1380_v56 = vld [vmem:[#allocation6 + $0x30] ss:$8 sps:$4 sm:$0xff]  }
  0x75   : > { %v1385_v57 = vld [vmem:[#allocation8 + $0x44] ss:$8 sps:$4 sm:$0xff]   ;;  %v1383_v59 = vld [vmem:[#allocation8 + $0x40] ss:$8 sps:$4 sm:$0xff]   ;;  %v1391_v61 = vld [vmem:[#allocation8 + $0x54] ss:$8 sps:$4 sm:$0xff]  }
  0x76   : > { %v1388_v58 = vld [vmem:[#allocation6 + $0x44] ss:$8 sps:$4 sm:$0xff]   ;;  %v1386_v60 = vld [vmem:[#allocation6 + $0x40] ss:$8 sps:$4 sm:$0xff]   ;;  %v1394_v62 = vld [vmem:[#allocation6 + $0x54] ss:$8 sps:$4 sm:$0xff]  }
  0x77   : > { %v1389_v63 = vld [vmem:[#allocation8 + $0x50] ss:$8 sps:$4 sm:$0xff]   ;;  %v1397_v4 = vld [vmem:[#allocation8 + $0x64] ss:$8 sps:$4 sm:$0xff]   ;;  %v1395_v7 = vld [vmem:[#allocation8 + $0x60] ss:$8 sps:$4 sm:$0xff]  }
  0x78   : > { %v1392_v3 = vld [vmem:[#allocation6 + $0x50] ss:$8 sps:$4 sm:$0xff]   ;;  %v1400_v6 = vld [vmem:[#allocation6 + $0x64] ss:$8 sps:$4 sm:$0xff]   ;;  %v1398_v8 = vld [vmem:[#allocation6 + $0x60] ss:$8 sps:$4 sm:$0xff]  }
  0x79   : > { %v1406_v10 = vld [vmem:[#allocation6 + $0x74] ss:$8 sps:$4 sm:$0xff]   ;;  %s1262_s12 = sshll.u32 %s1712_s7, 9  ;;  %s353_s14 = scalar_lea.vmem [#allocation9], %s1181_s11 }
  0x7a   : > { %s1080_s25 = sshll.u32 %s353_s14, 4  ;;  %s1944_s15 = scalar_lea.hbm %s2000_s8, %s1262_s12  ;;  %s1946_s25 = int_to_ptr.vmem [resolvable:$true] %s1080_s25 }
  0x7b   : > { %s1067_s7 = scalar_lea.sflag [#allocation5], %s1863_s28  ;;  %s1557_s11 = scalar_lea.vmem %s1946_s25, 512 }
  0x7c   : > { %p1558_p11 = scmp.ne.s32.totalorder %s1946_s25, %s1557_s11  ;;  %p2014_p0 = scmp.ne.s32.totalorder %s2009_s21, 0 }
  0x7d   : > { %s1640_s20 = smov [#allocation9]  }
  0x7e   : > { %p1559_p1 = pnand %p1558_p11, %p2014_p0  ;;  %s1561_s24 = sshll.u32 %s1640_s20, 4  ;;  %s1562_s24 = int_to_ptr.vmem [resolvable:$false] %s1561_s24 }
  0x7f   : > { %s1563_s17 = scalar_lea.vmem %s1562_s24, 1024  ;;  %p1564_p7 = scmp.lt.s32.totalorder %s1946_s25, %s1562_s24 }
  0x80   : > { %p1560_p3 = pneg %p1559_p1  ;;  %p1565_p9 = scmp.lt.s32.totalorder %s1563_s17, %s1557_s11 }
  0x82   : > { %p1566_p12 = por %p1565_p9, %p1564_p7 }
  0x84   : > { %436 = vperm.xlu1 %1357, %v432_v21   ;;  %v1421_v21 = vld [vmem:[#allocation8 + $0xa4] ss:$8 sps:$4 sm:$0xff]   ;;  %p1567_p2 = pnand %p1566_p12, %p1560_p3 }
  0x88   : > { %441 = vperm.xlu1 %1357, %v433_v22   ;;  %v1419_v22 = vld [vmem:[#allocation8 + $0xa0] ss:$8 sps:$4 sm:$0xff]  }
  0x89   : > { %381 = vperm.xlu0 %1356, %v378_v9   ;;  %v1403_v9 = vld [vmem:[#allocation8 + $0x74] ss:$8 sps:$4 sm:$0xff]  }
  0xfc   : > { %v361_v11 = vpop.xlane.xlu0 %360  ;;  %v369_v12 = vpop.xlane.xlu1 %368 }
  0xfd   : > { %v365_v13 = vmul.f32 0.00390625, %v361_v11  ;;  %v1401_v11 = vld [vmem:[#allocation8 + $0x70] ss:$8 sps:$4 sm:$0xff]  }
  0xff   : > { %v374_v17 = vsel %vm373_vm1, %v365_v13, %v369_v12  ;;  %v1404_v12 = vld [vmem:[#allocation6 + $0x70] ss:$8 sps:$4 sm:$0xff]   ;;  %v1409_v13 = vld [vmem:[#allocation8 + $0x84] ss:$8 sps:$4 sm:$0xff]  }
 0x100   : > { %v364_v14 = vpop.xlane.xlu0 %363  ;;  %v372_v15 = vpop.xlane.xlu1 %371 }
 0x101   : > { %v366_v16 = vmul.f32 0.00390625, %v364_v14  ;;  %v1412_v14 = vld [vmem:[#allocation6 + $0x84] ss:$8 sps:$4 sm:$0xff]  }
 0x103   : > { %v375_v18 = vsel %vm373_vm1, %v366_v16, %v372_v15  ;;  %v1407_v15 = vld [vmem:[#allocation8 + $0x80] ss:$8 sps:$4 sm:$0xff]  }
 0x104   : > { %v376_v19 = vpack.c.bf16 %v375_v18, %v374_v17  ;;  %v437_v33 = vpop.permute.xlu1 %436  ;;  %v1410_v16 = vld [vmem:[#allocation6 + $0x80] ss:$8 sps:$4 sm:$0xff]   ;;  %v1415_v17 = vld [vmem:[#allocation8 + $0x94] ss:$8 sps:$4 sm:$0xff]  }
 0x105   : > { %v1418_v18 = vld [vmem:[#allocation6 + $0x94] ss:$8 sps:$4 sm:$0xff]  }
 0x106   : > { %1268 = vmatpush3.bf16.msra.mxu0 %v376_v19  ;;  %v1413_v19 = vld [vmem:[#allocation8 + $0x90] ss:$8 sps:$4 sm:$0xff]  }
 0x107   : > { %792 = vmatprep.subr.bf16.mxu0 %v1361_v42  ;;  %v1431_v42 = vld [vmem:[#allocation8 + $0xc0] ss:$8 sps:$4 sm:$0xff]  }
 0x108   : > { %v382_v23 = vpop.permute.xlu0 %381  ;;  %v442_v39 = vpop.permute.xlu1 %441 }
 0x109   : > { %1270 = vmatmul.mubr.msk.bf16.vlgmr.msra.gmra.mrb[0].mxu0 %vm384_vm2, %v377_v20  ;;  %v1416_v20 = vld [vmem:[#allocation6 + $0x90] ss:$8 sps:$4 sm:$0xff]  }
 0x10a   : > { %793 = vmatpush1.bf16.msra.mxu0 %v1359_v41  ;;  %v1433_v41 = vld [vmem:[#allocation8 + $0xc4] ss:$8 sps:$4 sm:$0xff]  }
 0x10b   : > { %794 = vmatprep.subr.bf16.mxu0 %v1367_v45  ;;  %v1439_v45 = vld [vmem:[#allocation8 + $0xd4] ss:$8 sps:$4 sm:$0xff]  }
 0x10e   : > { %795 = vmatpush1.bf16.msra.mxu0 %v1365_v47  ;;  %v1442_v47 = vld [vmem:[#allocation6 + $0xd4] ss:$8 sps:$4 sm:$0xff]  }
 0x10f   : > { %796 = vmatprep.subr.bf16.mxu0 %v1373_v49  ;;  %v1445_v49 = vld [vmem:[#allocation8 + $0xe4] ss:$8 sps:$4 sm:$0xff]  }
 0x112   : > { %797 = vmatpush1.bf16.msra.mxu0 %v1371_v51  ;;  %v1446_v51 = vld [vmem:[#allocation6 + $0xe0] ss:$8 sps:$4 sm:$0xff]  }
 0x113   : > { %798 = vmatprep.subr.bf16.mxu0 %v1379_v53  ;;  %v1451_v53 = vld [vmem:[#allocation8 + $0xf4] ss:$8 sps:$4 sm:$0xff]  }
 0x116   : > { %799 = vmatpush1.bf16.msra.mxu0 %v1377_v55  ;;  %v1454_v55 = vld [vmem:[#allocation6 + $0xf4] ss:$8 sps:$4 sm:$0xff]  }
 0x117   : > { %800 = vmatprep.subr.bf16.mxu0 %v1385_v57 }
 0x11a   : > { %801 = vmatpush1.bf16.msra.mxu0 %v1383_v59 }
 0x11b   : > { %802 = vmatprep.subr.bf16.mxu0 %v1391_v61 }
 0x11e   : > { %803 = vmatpush1.bf16.msra.mxu0 %v1389_v63 }
 0x11f   : > { %804 = vmatprep.subr.bf16.mxu0 %v1397_v4 }
 0x122   : > { %805 = vmatpush1.bf16.msra.mxu0 %v1395_v7 }
 0x123   : > { %806 = vmatprep.subr.bf16.mxu0 %v1403_v9 }
 0x126   : > { %807 = vmatpush1.bf16.msra.mxu0 %v1401_v11 }
 0x127   : > { %808 = vmatprep.subr.bf16.mxu0 %v1409_v13 }
 0x12a   : > { %809 = vmatpush1.bf16.msra.mxu0 %v1407_v15 }
 0x12b   : > { %810 = vmatprep.subr.bf16.mxu0 %v1415_v17 }
 0x12e   : > { %811 = vmatpush1.bf16.msra.mxu0 %v1413_v19 }
 0x12f   : > { %812 = vmatprep.subr.bf16.mxu0 %v1421_v21 }
 0x132   : > { %813 = vmatpush1.bf16.msra.mxu0 %v1419_v22 }
 0x1dc   : > { %v422_v24 = vpop.f32.mrb[0].mxu0 }
 0x1dd   : > { %v423_v25 = vadd.f32 %v422_v24, %v382_v23  ;;  %v1271_v26 = vpop.f32.mrb[1].mxu0 }
 0x1de   : > { %v425_v27 = vpop.f32.mrb[2].mxu0 }
 0x1df   : > { %v428_v28 = vmax.f32 %v423_v25, 0.0  ;;  %v1272_v29 = vpop.f32.mrb[3].mxu0 }
 0x1e1   : > { %v429_v30 = vpack.c.bf16 %v428_v28, %v428_v28 }
 0x1e3   : > { %v455_v31 = vsel %vm453_vm3, %v429_v30, 0 }
 0x1e4   : > { %1274 = vmatpush3.bf16.msra.mxu1 %v455_v31 }
 0x1e5   : > { %993 = vmatprep.subr.bf16.mxu1 %v1364_v44  ;;  %v1434_v44 = vld [vmem:[#allocation6 + $0xc0] ss:$8 sps:$4 sm:$0xff]  }
 0x1e7   : > { %1276 = vmatmul.mubr.msk.bf16.vlgmr.msra.gmra.mrb[0].mxu1 %vm449_vm4, %v1358_v32 }
 0x1e8   : > { %994 = vmatpush1.bf16.msra.mxu1 %v1362_v43  ;;  %v1436_v43 = vld [vmem:[#allocation6 + $0xc4] ss:$8 sps:$4 sm:$0xff]  }
 0x1e9   : > { %995 = vmatprep.subr.bf16.mxu1 %v1370_v46  ;;  %v1437_v46 = vld [vmem:[#allocation8 + $0xd0] ss:$8 sps:$4 sm:$0xff]  }
 0x1ec   : > { %996 = vmatpush1.bf16.msra.mxu1 %v1368_v48  ;;  %v1440_v48 = vld [vmem:[#allocation6 + $0xd0] ss:$8 sps:$4 sm:$0xff]  }
 0x1ed   : > { %997 = vmatprep.subr.bf16.mxu1 %v1376_v50  ;;  %v1443_v50 = vld [vmem:[#allocation8 + $0xe0] ss:$8 sps:$4 sm:$0xff]  }
 0x1f0   : > { %998 = vmatpush1.bf16.msra.mxu1 %v1374_v52  ;;  %v1448_v52 = vld [vmem:[#allocation6 + $0xe4] ss:$8 sps:$4 sm:$0xff]  }
 0x1f1   : > { %999 = vmatprep.subr.bf16.mxu1 %v1382_v54  ;;  %v1449_v54 = vld [vmem:[#allocation8 + $0xf0] ss:$8 sps:$4 sm:$0xff]  }
 0x1f4   : > { %1000 = vmatpush1.bf16.msra.mxu1 %v1380_v56  ;;  %v1452_v56 = vld [vmem:[#allocation6 + $0xf0] ss:$8 sps:$4 sm:$0xff]  }
 0x1f5   : > { %1001 = vmatprep.subr.bf16.mxu1 %v1388_v58 }
 0x1f8   : > { %1002 = vmatpush1.bf16.msra.mxu1 %v1386_v60 }
 0x1f9   : > { %1003 = vmatprep.subr.bf16.mxu1 %v1394_v62 }
 0x1fc   : > { %1004 = vmatpush1.bf16.msra.mxu1 %v1392_v3 }
 0x1fd   : > { %1005 = vmatprep.subr.bf16.mxu1 %v1400_v6 }
 0x200   : > { %1006 = vmatpush1.bf16.msra.mxu1 %v1398_v8 }
 0x201   : > { %1007 = vmatprep.subr.bf16.mxu1 %v1406_v10 }
 0x204   : > { %1008 = vmatpush1.bf16.msra.mxu1 %v1404_v12 }
 0x205   : > { %1009 = vmatprep.subr.bf16.mxu1 %v1412_v14 }
 0x208   : > { %1010 = vmatpush1.bf16.msra.mxu1 %v1410_v16 }
 0x209   : > { %1011 = vmatprep.subr.bf16.mxu1 %v1418_v18 }
 0x20c   : > { %1012 = vmatpush1.bf16.msra.mxu1 %v1416_v20 }
 0x2ba   : > { %v491_v34 = vpop.f32.mrb[0].mxu1 }
 0x2bb   : > { %v1908_v35 = vadd.f32 %v491_v34, %v437_v33  ;;  %v1277_v36 = vpop.f32.mrb[1].mxu1  ;;  %v1424_v34 = vld [vmem:[#allocation6 + $0xa4] ss:$8 sps:$4 sm:$0xff]  }
 0x2bc   : > { %v494_v37 = vpop.f32.mrb[2].mxu1  ;;  %v1422_v36 = vld [vmem:[#allocation6 + $0xa0] ss:$8 sps:$4 sm:$0xff]   ;;  %1013 = vmatprep.subr.bf16.mxu1 %v1424_v34 }
 0x2bd   : > { %500 = vrot.lane.b32.xlu1 %v1908_v35, %s1639_s23  ;;  %v1278_v38 = vpop.f32.mrb[3].mxu1  ;;  %v1911_v40 = vadd.f32 %v494_v37, %v442_v39  ;;  %v1425_v37 = vld [vmem:[#allocation8 + $0xb0] ss:$8 sps:$4 sm:$0xff]   ;;  %1014 = vmatpush1.bf16.msra.mxu1 %v1422_v36  ;;  %v1430_v39 = vld [vmem:[#allocation6 + $0xb4] ss:$8 sps:$4 sm:$0xff]  }
 0x2be   : > { %v1427_v38 = vld [vmem:[#allocation8 + $0xb4] ss:$8 sps:$4 sm:$0xff]   ;;  %1015 = vmatprep.subr.bf16.mxu1 %v1430_v39 }
 0x2bf   : > { %814 = vmatprep.subr.bf16.mxu0 %v1427_v38  ;;  %v1035_v38 = vstv %s1034_s26 }
 0x2c0   : > { %815 = vmatpush1.bf16.msra.mxu0 %v1425_v37 }
 0x2c1   : > { %502 = vrot.lane.b32.xlu1 %v1911_v40, %s1639_s23  ;;  %816 = vmatprep.subr.bf16.mxu0 %v1433_v41 }
 0x2c4   : > { %817 = vmatpush1.bf16.msra.mxu0 %v1431_v42 }
 0x2c5   : > { %818 = vmatprep.subr.bf16.mxu0 %v1439_v45 }
 0x2c8   : > { %819 = vmatpush1.bf16.msra.mxu0 %v1437_v46 }
 0x2c9   : > { %820 = vmatprep.subr.bf16.mxu0 %v1445_v49 }
 0x2cc   : > { %821 = vmatpush1.bf16.msra.mxu0 %v1443_v50 }
 0x2cd   : > { %822 = vmatprep.subr.bf16.mxu0 %v1451_v53 }
 0x2d0   : > { %823 = vmatpush1.bf16.msra.mxu0 %v1449_v54 }
 0x32f   : > { %v501_v23 = vpop.permute.xlu1 %500 }
 0x330   : > { %v506_v24 = vadd.f32 %v501_v23, %v1908_v35 }
 0x332   : > { %v1188_v25 = vmul.f32 -1.442695, %v506_v24 }
 0x333   : > { %v503_v26 = vpop.permute.xlu1 %502 }
 0x334   : > { %1455 = vpow2.f32 %v1188_v25  ;;  %v507_v27 = vadd.f32 %v503_v26, %v1911_v40  ;;  %v1428_v40 = vld [vmem:[#allocation6 + $0xb0] ss:$8 sps:$4 sm:$0xff]  }
 0x335   : > { %1016 = vmatpush1.bf16.msra.mxu1 %v1428_v40 }
 0x336   : > { %v1189_v28 = vmul.f32 -1.442695, %v507_v27  ;;  %1017 = vmatprep.subr.bf16.mxu1 %v1436_v43 }
 0x338   : > { %1457 = vpow2.f32 %v1189_v28 }
 0x339   : > { %1018 = vmatpush1.bf16.msra.mxu1 %v1434_v44 }
 0x33a   : > { %1019 = vmatprep.subr.bf16.mxu1 %v1442_v47 }
 0x33d   : > { %1020 = vmatpush1.bf16.msra.mxu1 %v1440_v48 }
 0x33e   : > { %v1456_v29 = vpop.eup %1455  ;;  %1021 = vmatprep.subr.bf16.mxu1 %v1448_v52 }
 0x33f   : > { %v514_v30 = vadd.f32 1.0, %v1456_v29 }
 0x341   : > { %1459 = vrcp.f32 %v514_v30  ;;  %1022 = vmatpush1.bf16.msra.mxu1 %v1446_v51  ;;  %v1050_v51 = vlaneseq }
 0x342   : > { %v1458_v31 = vpop.eup %1457  ;;  %1023 = vmatprep.subr.bf16.mxu1 %v1454_v55 }
 0x343   : > { %v515_v32 = vadd.f32 1.0, %v1458_v31  ;;  %v1051_v53 = vshrl.u32 %v1050_v51, 7 }
 0x345   : > { %1461 = vrcp.f32 %v515_v32  ;;  %1024 = vmatpush1.bf16.msra.mxu1 %v1452_v56  ;;  %v1052_v54 = vsub.s32 0, %v1051_v53 }
 0x34b   : > { %v1460_v33 = vpop.eup %1459 }
 0x34c   : > { %522 = vperm.xlu1 %1357, %v1460_v33  }
 0x34f   : > { %v1462_v35 = vpop.eup %1461 }
 0x350   : > { %527 = vperm.xlu1 %1357, %v1462_v35  }
 0x3cb   : > { %v523_v57 = vpop.permute.xlu1 %522 }
 0x3cc   : > { %v1917_v59 = vmul.f32 %v523_v57, %v1877_v0  ;;  %v1920_v60 = vmul.f32 %v523_v57, %v1879_v1 }
 0x3cf   : > { %v528_v58 = vpop.permute.xlu1 %527 }
 0x3d0   : > { %v1923_v61 = vmul.f32 %v528_v58, %v1881_v2  ;;  %v1926_v62 = vmul.f32 %v528_v58, %v1887_v5 }
 0x3d2   : > { %v534_v63 = vadd.f32 %v1923_v61, %v1917_v59  ;;  %v541_v3 = vadd.f32 %v1926_v62, %v1920_v60  ;;  %v550_v4 = vmax.f32 %v1917_v59, %v1923_v61  ;;  %v557_v0 = vmax.f32 %v1920_v60, %v1926_v62 }
 0x3d4   : > { %v535_v1 = vrot.slane %v534_v63, 4  ;;  %v542_v6 = vrot.slane %v541_v3, 4  ;;  %v551_v7 = vrot.slane %v550_v4, 4  ;;  %v558_v2 = vrot.slane %v557_v0, 4 }
 0x3d6   : > { %v536_v8 = vadd.f32 %v535_v1, %v534_v63  ;;  %v543_v9 = vadd.f32 %v542_v6, %v541_v3  ;;  %v552_v5 = vmax.f32 %v550_v4, %v551_v7  ;;  %v559_v10 = vmax.f32 %v557_v0, %v558_v2 }
 0x3d8   : > { %v537_v11 = vrot.slane %v536_v8, 2  ;;  %v553_v12 = vrot.slane %v552_v5, 2  ;;  %v560_v13 = vrot.slane %v559_v10, 2  ;;  %v544_v14 = vrot.slane %v543_v9, 2 }
 0x3da   : > { %v538_v15 = vadd.f32 %v537_v11, %v536_v8  ;;  %v554_v16 = vmax.f32 %v552_v5, %v553_v12  ;;  %v561_v17 = vmax.f32 %v559_v10, %v560_v13  ;;  %v545_v18 = vadd.f32 %v544_v14, %v543_v9 }
 0x3dc   : > { %v562_v19 = vrot.slane %v561_v17, 1  ;;  %v555_v20 = vrot.slane %v554_v16, 1  ;;  %v546_v21 = vrot.slane %v545_v18, 1  ;;  %v539_v22 = vrot.slane %v538_v15, 1 }
 0x3de   : > { %v563_v23 = vmax.f32 %v561_v17, %v562_v19  ;;  %v556_v24 = vmax.f32 %v554_v16, %v555_v20  ;;  %v547_v25 = vadd.f32 %v546_v21, %v545_v18  ;;  %v540_v26 = vadd.f32 %v539_v22, %v538_v15 }
 0x3e0   : > { %v567_v27 = vpack.c.bf16 %v563_v23, %v563_v23  ;;  %v566_v28 = vpack.c.bf16 %v556_v24, %v556_v24  ;;  %v549_v29 = vmul.f32 0.0625, %v547_v25  ;;  %v548_v30 = vmul.f32 0.0625, %v540_v26 }
 0x3e2   : > { %824 = vmatprep.mubr.bf16.mxu0 %v567_v27  ;;  %v565_v31 = vpack.c.bf16 %v549_v29, %v549_v29  ;;  %v564_v32 = vpack.c.bf16 %v548_v30, %v548_v30 }
 0x3e3   : > { %825 = vmatmul.mubr.bf16.vlgmr.msra.gmra.mrb[4].mxu0 %v566_v28 }
 0x3e4   : > { %1025 = vmatprep.mubr.bf16.mxu1 %v565_v31 }
 0x3e5   : > { %1026 = vmatmul.mubr.bf16.vlgmr.msra.gmra.mrb[4].mxu1 %v564_v32 }
 0x4b6   : > { %v826_v33 = vpop.f32.mrb[4].mxu0 }
 0x4b7   : > { %v828_v34 = vpop.f32.mrb[5].mxu0 }
 0x4b8   : > { %v830_v36 = vpop.f32.mrb[6].mxu0  ;;  %v1027_v37 = vpop.f32.mrb[4].mxu1 }
 0x4b9   : > { %v1028_v35 = vadd.f32 %v1027_v37, %v826_v33  ;;  %v831_v39 = vpop.f32.mrb[7].mxu0  ;;  %v1029_v40 = vpop.f32.mrb[5].mxu1 }
 0x4ba   : > { %v1030_v41 = vadd.f32 %v1029_v40, %v828_v34  ;;  %v1031_v42 = vpop.f32.mrb[6].mxu1 }
 0x4bb   : > { %v1036_v43 = vadd.f32 %v1035_v38, %v1028_v35  ;;  %v1032_v44 = vpop.f32.mrb[7].mxu1 }
 0x4bc   : > { %v1037_v45 = vadd.f32 %v1035_v38, %v1030_v41 }
 0x4bd   : > { %v1254_v46 = vmul.f32 -1.442695, %v1036_v43 }
 0x4be   : > { %v1255_v47 = vmul.f32 -1.442695, %v1037_v45 }
 0x4bf   : > { %1463 = vpow2.f32 %v1254_v46 }
 0x4c0   : > { %1465 = vpow2.f32 %v1255_v47 }
 0x4c9   : > { %v1464_v48 = vpop.eup %1463 }
 0x4ca   : > { %v1466_v49 = vpop.eup %1465  ;;  %v1044_v50 = vadd.f32 1.0, %v1464_v48 }
 0x4cb   : > { %v1045_v52 = vadd.f32 1.0, %v1466_v49 }
 0x4cc   : > { %1467 = vrcp.f32 %v1044_v50 }
 0x4cd   : > { %1469 = vrcp.f32 %v1045_v52 }
 0x4d6   : > { %v1468_v55 = vpop.eup %1467 }
 0x4d7   : > { %v1470_v56 = vpop.eup %1469  ;;  %v1053_v57 = vrot.slane %v1468_v55, %v1052_v54 }
 0x4d8   : > { %v1057_v58 = vrot.slane %v1470_v56, %v1052_v54 }
 0x4d9   : > { %v1058_v63 = vmul.f32 %v1053_v57, %v1917_v59  ;;  %v1060_v3 = vmul.f32 %v1053_v57, %v1923_v61 }
 0x4da   : > { %v1059_v4 = vmul.f32 %v1057_v58, %v1920_v60  ;;  %v1061_v0 = vmul.f32 %v1057_v58, %v1926_v62 }
 0x4db   : > { %1062 = vst [vmem:[%s353_s14] sm:$0xff] %v1058_v63  ;;  %1064 = vst [vmem:[%s353_s14 + $0x10] sm:$0xff] %v1060_v3 }
 0x4dc   : > { %1063 = vst [vmem:[%s353_s14 + $0x8] sm:$0xff] %v1059_v4  ;;  %1065 = vst [vmem:[%s353_s14 + $0x18] sm:$0xff] %v1061_v0 }
 0x4dd   : > { %1570 = shalt.err (!%p1567_p2)
}
 0x4de   : > { %s1571_s19 = scalar_lea.hbm %s1944_s15, 512  ;;  %s1575_s12 = scalar_lea.hbm %s2000_s8, 1024 }
 0x4df   : > { %p1572_p13 = scmp.ne.s32.totalorder %s1944_s15, %s1571_s19  ;;  %p1576_p4 = scmp.lt.u32.totalorder %s1944_s15, %s2000_s8 }
 0x4e0   : > { %p1577_p5 = scmp.lt.u32.totalorder %s1575_s12, %s1571_s19  ;;  %p1579_p11 = scmp.lt.u32.totalorder %s1571_s19, %s1944_s15 }
 0x4e1   : > { %p1573_p6 = pnand %p1572_p13, %p2014_p0 }
 0x4e2   : > { %p1578_p8 = por %p1577_p5, %p1576_p4 }
 0x4e3   : > { %p1574_p10 = pneg %p1573_p6 }
 0x4e4   : > { %p1580_p1 = por %p1579_p11, %p1578_p8 }
 0x4e6   : > { %p1581_p3 = pnand %p1580_p1, %p1574_p10 }
 0x4e8   : > { %1584 = shalt.err (!%p1581_p3)
}
 0x4e9   : > { %s1641_s27 = smov 256   ;;  %s1642_s11 = smov 16  }
 0x4ea   : > { %1289 = dma.vmem_to_hbm [thread:$0]  (%p2014_p0), %s1946_s25, 512, %s1944_s15, %s1067_s7, %s1641_s27, %s1641_s27, %s1642_s11  }
 0x4eb PF: > { %s1095_s20 = sand.u32 1, %s1615_s29   ;;  %p2015_p7 = scmp.ne.s32.totalorder %s2005_s13, 0 }
 0x4ec   : > { %p2016_p9 = scmp.ge.s32.totalorder %s1627_s10, 2  ;;  %s1096_s24 = scalar_lea.sflag [#allocation5], %s1095_s20 }
 0x4ee   : > { %p1303_p12 = pnand %p2016_p9, %p2015_p7 }
 0x4f0   : > { %1610 = dma.done.wait (!%p1303_p12), %s1096_s24, 512  }
 0x4f1   : > { %1612 = vsyncadd (!%p1303_p12), %s1096_s24, 4294966784  ;;  %p23_p2 = scmp.ge.s32.totalorder %s1801_s18, 4   ;;  %s2017_s29 = smov %s1619_s30 }
 0x4f2   : > { %s2018_s30 = smov %s1623_s9  ;;  %s2019_s9 = smov %s1817_s22 }
 0x4f3   : > { %s2020_s10 = smov %s1801_s18  ;;  %25 = sbr.rel (!%p23_p2) target bundleno = 8 (0x8), region = 105 }
 0x4fa   :  { %1101 = vsyncpa [#allocation4], 1 }
 0x4fb   :  { %1103 = vsyncpa [#allocation4 + $0x1], 1 }
 0x4fc   :  { %1104 = vsyncpa [#allocation7], 1 }
 0x4fd   :  { %1105 = vsyncpa [#allocation5], 1 }
 0x4fe   :  { %1107 = vsyncpa [#allocation5 + $0x1], 1 }

</bundles_post_ra>
